<compile_context>
chip_gen: v7x
topology: tpu7x:2x2x1
jax: 0.10.0
libtpu: 0.0.40
codegen_flags: <defaults>
</compile_context>

<pallas_src>
import jax
import jax.numpy as jnp
from jax.experimental import pallas as pl
from jax.experimental.pallas import tpu as pltpu

EPS = 1e-5
TAPS = 12      # conv2 temporal kernel width
POOL_K = 62    # AvgPool2d kernel width
POOL_S = 12    # AvgPool2d stride
N_CH2 = 20     # conv2 output channels
N_CLS = 4      # fc output classes


# ----------------------------------------------------------------------------
# pltpu.roll direction probe (one tiny kernel), so the im2col left-shift below is
# correct regardless of the rotate convention; falls back to jnp.roll on any issue.
# ----------------------------------------------------------------------------
_ROLL_SIGN = None   # +1: pltpu.roll == jnp.roll; -1: opposite direction; 0: use jnp.roll


def _detect_roll_convention():
    global _ROLL_SIGN
    if _ROLL_SIGN is not None:
        return
    try:
        def probe(x_ref, o_ref):
            o_ref[...] = pltpu.roll(x_ref[...], 1, 1)

        lane = (jnp.arange(512, dtype=jnp.float32) % 128).astype(jnp.bfloat16)
        x = jnp.broadcast_to(lane, (16, 512))
        out = jax.device_get(pl.pallas_call(
            probe, out_shape=jax.ShapeDtypeStruct((16, 512), jnp.bfloat16))(x))
        v = float(out[0, 0])
        if v == 127.0:
            _ROLL_SIGN = 1      # out[i] = in[(i - shift) % n]  (jnp.roll convention)
        elif v == 1.0:
            _ROLL_SIGN = -1     # out[i] = in[(i + shift) % n]
        else:
            _ROLL_SIGN = 0
    except Exception:
        _ROLL_SIGN = 0


def _shift_left_lanes(x, j):
    """result[..., t] = x[..., (t + j) % W]  (lane left-shift by j with wrap-around)."""
    if j == 0:
        return x
    w = x.shape[-1]
    if _ROLL_SIGN == 1:
        return pltpu.roll(x, w - j, 1)
    if _ROLL_SIGN == -1:
        return pltpu.roll(x, j, 1)
    return jnp.roll(x, -j, axis=-1)


# ----------------------------------------------------------------------------
# Kernel: one grid step == one block of `block_b` batch elements, fully fused.
# ----------------------------------------------------------------------------
def sccnet_kernel(x_ref, w1_ref, s1_ref, t1m_ref, w2f_ref, s2_ref, t2_ref,
                  pool_ref, wfc_ref, gsum_ref, bfc_ref, out_ref, stack_ref):
    Nu = w1_ref.shape[0]
    n_ch2 = s2_ref.shape[0]
    n_cls = bfc_ref.shape[0]
    taps = w2f_ref.shape[1] // Nu

    # ---- conv1 (1->Nu, kernel (C,1)) for the whole block: one bf16 MXU matmul ----
    h1 = jnp.dot(w1_ref[...], x_ref[...], preferred_element_type=jnp.float32)  # (Nu, BB*Tp)
    # Folded BN1 (+conv1 bias).  t1m is zero on every pad lane and x is zero there too,
    # so h1p is exactly conv2's zero-padded input, one 512-lane segment per batch elem.
    h1p = (s1_ref[...] * h1 + t1m_ref[...]).astype(jnp.bfloat16)
    # TODO(synk): Dropout layers are stochastic; treated as identity (eval mode).

    # ---- conv2 im2col: 12 full-width lane rotations (XLU) + aligned full-vreg stores ----
    for j in range(taps):
        stack_ref[j * Nu:(j + 1) * Nu, :] = _shift_left_lanes(h1p, j)

    # ---- conv2 (1->20, kernel (Nu,12), pad (0,5)) as ONE matmul over the block ----
    acc = jnp.dot(w2f_ref[...], stack_ref[...],
                  preferred_element_type=jnp.float32)            # (20, BB*Tp)
    h2 = s2_ref[...] * acc + t2_ref[...]                         # folded BN2
    h2sq = (h2 * h2).astype(jnp.bfloat16)                        # SquareLayer, bf16 once

    # ---- AvgPool2d((1,62), stride (1,12)) as one matmul with a {0,1} block-diagonal
    # pool matrix; its zero rows (>= Wout inside each segment) kill the lane-padding /
    # roll-wrap garbage columns.  The exact /62 is applied in f32 afterwards. ----
    pooled = jnp.dot(h2sq, pool_ref[...],
                     preferred_element_type=jnp.float32) * (1.0 / POOL_K)   # (20, BB*32)
    # maximum() only guards bf16-induced underflow to exactly 0 (unreachable with these
    # parameters); the exact computation (and the reference) would give -inf there.
    feats = jnp.log(jnp.maximum(pooled, 1e-37))

    # ---- fc: Linear(20*32 -> 4).  Per-class weighting + pool-axis contraction on the
    # MXU, channel-group sums on the idle XLU (no batch-selector matmul on the tail). ----
    featsc = jnp.concatenate([feats] * n_cls, axis=0)            # (4*20, BB*32)
    persum = jnp.dot(featsc * wfc_ref[...], gsum_ref[...],
                     preferred_element_type=jnp.float32)         # (4*20, BB)
    logits = jnp.concatenate(
        [jnp.sum(persum[k * n_ch2:(k + 1) * n_ch2, :], axis=0, keepdims=True)
         for k in range(n_cls)], axis=0)                         # (4, BB)
    out_ref[...] = logits + bfc_ref[...]


def sccnet_forward(x, p, block_b=None):
    B, C, T = x.shape
    Nu = p["w1"].shape[0]
    Tp = p["t1m_seg"].shape[1]            # lane-aligned padded time axis (512 for T=438)
    n_pool = p["pool_seg"].shape[1]
    Wout = T - 1
    assert p["pool_seg"].shape[0] == Tp and Tp >= T + 10 and Tp % 128 == 0

    _detect_roll_convention()

    if block_b is None:
        # Bigger blocks amortize the ~0.35us/step overhead and widen the fused conv2 /
        # pool matmuls, but the block-diagonal pool matrix wastes O(block_b) MACs per
        # element; 8 balances that and keeps all constants tiny in VMEM on every
        # generation.  Keep >=2 grid steps when B >= 2 so both v7x TensorCores get work.
        block_b = max(1, min(8, B // 2))
    steps = pl.cdiv(B, block_b)
    if steps > 1 and steps % 2:
        steps += 1                        # even step count -> balanced v7x core split
    Bp = steps * block_b

    # x: pad batch to Bp, embed time at offset 5 of a zero Tp-lane segment (conv2's
    # (0,5) zero padding + lane alignment), then lay each block out as ONE
    # (C, block_b*Tp) slab so conv1 is a single matmul per grid step.
    x_pad = jnp.pad(x, ((0, Bp - B), (0, 0), (5, Tp - T - 5)))
    x_slab = jnp.transpose(x_pad.reshape(steps, block_b, C, Tp), (0, 2, 1, 3))
    x_slab = x_slab.reshape(steps, C, block_b * Tp).astype(jnp.bfloat16)

    # Block-level constants (built once, host-side).
    t1m = jnp.tile(p["t1m_seg"], (1, block_b))                                # (Nu, BB*Tp)
    pool_seg = p["pool_seg"]
    assert bool(jnp.all(pool_seg[Wout:, :] == 0)), "pool rows past Wout must be zero"
    pool_bd = jnp.kron(jnp.eye(block_b, dtype=jnp.float32),
                       pool_seg).astype(jnp.bfloat16)                         # (BB*Tp, BB*32)
    gsum = jnp.kron(jnp.eye(block_b, dtype=jnp.float32),
                    jnp.ones((n_pool, 1), jnp.float32))                       # (BB*32, BB)
    wfc_slab = jnp.tile(p["wfc_kc"], (1, block_b))                            # (80, BB*32)

    BBT = block_b * Tp
    # TODO(synk): the constant operands below could be single-buffered via
    # pipeline_mode=pl.Buffered(1); skipped for lowering safety (their block index is
    # constant, so they are only fetched once anyway).
    out = pl.pallas_call(
        sccnet_kernel,
        out_shape=jax.ShapeDtypeStruct((steps, N_CLS, block_b), jnp.float32),
        grid_spec=pltpu.PrefetchScalarGridSpec(
            num_scalar_prefetch=0,
            grid=(steps,),
            in_specs=[
                pl.BlockSpec((None, C, BBT), lambda b: (b, 0, 0)),             # x slab (bf16)
                pl.BlockSpec((Nu, C), lambda b: (0, 0)),                       # conv1 weight (bf16)
                pl.BlockSpec((Nu, 1), lambda b: (0, 0)),                       # bn1 scale
                pl.BlockSpec((Nu, BBT), lambda b: (0, 0)),                     # bn1 shift, pad-masked
                pl.BlockSpec((N_CH2, TAPS * Nu), lambda b: (0, 0)),            # conv2 weight, tap-major (bf16)
                pl.BlockSpec((N_CH2, 1), lambda b: (0, 0)),                    # bn2 scale
                pl.BlockSpec((N_CH2, 1), lambda b: (0, 0)),                    # bn2 shift
                pl.BlockSpec((BBT, block_b * n_pool), lambda b: (0, 0)),       # block-diag pool matrix (bf16)
                pl.BlockSpec((N_CLS * N_CH2, block_b * n_pool), lambda b: (0, 0)),  # fc weight slab
                pl.BlockSpec((block_b * n_pool, block_b), lambda b: (0, 0)),   # pool-group selector
                pl.BlockSpec((N_CLS, 1), lambda b: (0, 0)),                    # fc bias
            ],
            out_specs=pl.BlockSpec((None, N_CLS, block_b), lambda b: (b, 0, 0)),
            scratch_shapes=[
                pltpu.VMEM((TAPS * Nu, BBT), jnp.bfloat16),                    # im2col stack
            ],
        ),
        compiler_params=pltpu.CompilerParams(dimension_semantics=("parallel",)),
    )(x_slab, p["w1"], p["s1"], t1m, p["w2f"], p["s2"], p["t2"],
      pool_bd, wfc_slab, gsum, p["bfc"])
    return jnp.transpose(out, (0, 2, 1)).reshape(Bp, N_CLS)[:B]


def init_params(key, C, Nu, T):
    """Deterministic synthetic parameters (shapes match SCCNet.__init__ with Nt=1)."""
    Wout = T - 1
    n_pool = (Wout - POOL_K) // POOL_S + 1
    assert N_CH2 * n_pool == 640, "fc in_features is hardcoded to 640 in the module"
    Tp = ((T + 10) + 127) // 128 * 128
    ks = jax.random.split(key, 14)

    raw = {
        "w1": 0.3 * jax.random.normal(ks[0], (Nu, 1, C, 1), jnp.float32),
        "b1": 0.1 * jax.random.normal(ks[1], (Nu,), jnp.float32),
        "g1": 1.0 + 0.1 * jax.random.normal(ks[2], (Nu,), jnp.float32),
        "beta1": 0.1 * jax.random.normal(ks[3], (Nu,), jnp.float32),
        "m1": 0.1 * jax.random.normal(ks[4], (Nu,), jnp.float32),
        "v1": 0.5 + jax.random.uniform(ks[5], (Nu,), jnp.float32),
        "w2": 0.1 * jax.random.normal(ks[6], (N_CH2, 1, Nu, TAPS), jnp.float32),
        "b2": 0.1 * jax.random.normal(ks[7], (N_CH2,), jnp.float32),
        "g2": 1.0 + 0.1 * jax.random.normal(ks[8], (N_CH2,), jnp.float32),
        "beta2": 0.1 * jax.random.normal(ks[9], (N_CH2,), jnp.float32),
        "m2": 0.1 * jax.random.normal(ks[10], (N_CH2,), jnp.float32),
        "v2": 0.5 + jax.random.uniform(ks[11], (N_CH2,), jnp.float32),
        "wfc": 0.05 * jax.random.normal(ks[12], (N_CLS, N_CH2 * n_pool), jnp.float32),
        "bfc": 0.1 * jax.random.normal(ks[13], (N_CLS,), jnp.float32),
    }

    # Fold conv bias + eval-mode BatchNorm into per-channel scale/shift.
    s1 = raw["g1"] / jnp.sqrt(raw["v1"] + EPS)
    t1 = s1 * (raw["b1"] - raw["m1"]) + raw["beta1"]
    s2 = raw["g2"] / jnp.sqrt(raw["v2"] + EPS)
    t2 = s2 * (raw["b2"] - raw["m2"]) + raw["beta2"]

    # BN1 shift broadcast over one Tp-lane time segment, zero on every pad lane
    # (5 left, right + lane-alignment), so conv1-of-prepadded-x IS conv2's padded input.
    t1m_seg = jnp.zeros((Nu, Tp), jnp.float32).at[:, 5:5 + T].set(
        jnp.broadcast_to(t1.reshape(Nu, 1), (Nu, T)))

    # conv2 weight flattened tap-major: column j*Nu+u == W2[o, 0, u, j], matching the
    # im2col stack row order used in the kernel.
    w2f = jnp.transpose(raw["w2"][:, 0], (0, 2, 1)).reshape(N_CH2, TAPS * Nu)

    # AvgPool2d((1,62), stride (1,12)) as a {0,1} (Tp, n_pool) matrix; rows >= Wout stay
    # exactly zero so lane-padding / roll-wrap garbage never reaches the output.
    pool_seg = jnp.zeros((Tp, n_pool), jnp.float32)
    for q in range(n_pool):
        pool_seg = pool_seg.at[q * POOL_S:q * POOL_S + POOL_K, q].set(1.0)

    # fc weight regrouped to (class*channel, pool): wfc_kc[k*20 + c, p] = wfc[k, c*32 + p]
    # (torch flatten order is channel-major: feature index = c*n_pool + p).
    wfc_kc = raw["wfc"].reshape(N_CLS, N_CH2, n_pool).reshape(N_CLS * N_CH2, n_pool)

    folded = {
        "w1": raw["w1"][:, 0, :, 0].astype(jnp.bfloat16),   # (Nu, C)
        "s1": s1.reshape(Nu, 1),
        "t1m_seg": t1m_seg,                                 # (Nu, Tp)
        "w2f": w2f.astype(jnp.bfloat16),                    # (20, 12*Nu)
        "s2": s2.reshape(N_CH2, 1),
        "t2": t2.reshape(N_CH2, 1),
        "pool_seg": pool_seg,                               # (Tp, n_pool), {0,1}
        "wfc_kc": wfc_kc,                                   # (80, n_pool)
        "bfc": raw["bfc"].reshape(N_CLS, 1),
    }
    return raw, folded


def reference_forward(x, raw):
    """Plain-JAX re-implementation of the PyTorch forward (eval mode) for checking."""
    B, C, T = x.shape
    x4 = x.reshape(B, 1, C, T)
    dn = ("NCHW", "OIHW", "NCHW")

    def bn(h, g, beta, m, v):
        return (g[None, :, None, None] * (h - m[None, :, None, None])
                / jnp.sqrt(v[None, :, None, None] + EPS) + beta[None, :, None, None])

    h1 = jax.lax.conv_general_dilated(x4, raw["w1"], (1, 1), ((0, 0), (0, 0)),
                                      dimension_numbers=dn)
    h1 = h1 + raw["b1"][None, :, None, None]
    h1 = bn(h1, raw["g1"], raw["beta1"], raw["m1"], raw["v1"])
    h1 = h1.reshape(B, 1, h1.shape[1], h1.shape[3])

    h2 = jax.lax.conv_general_dilated(h1, raw["w2"], (1, 1), ((0, 0), (5, 5)),
                                      dimension_numbers=dn)
    h2 = h2 + raw["b2"][None, :, None, None]
    h2 = bn(h2, raw["g2"], raw["beta2"], raw["m2"], raw["v2"])
    h2 = h2 ** 2
    h2 = h2.reshape(B, 1, h2.shape[1], h2.shape[3])

    pooled = jax.lax.reduce_window(h2, 0.0, jax.lax.add,
                                   (1, 1, 1, POOL_K), (1, 1, 1, POOL_S), "VALID") / POOL_K
    feats = jnp.log(pooled).reshape(B, -1)
    return feats @ raw["wfc"].T + raw["bfc"]


if __name__ == "__main__":
    # Small shapes consistent with the module: Nt=1 (required by the internal views),
    # T=438 because fc in_features is hardcoded to 20*int((438-62)/12+1)=640.
    B, C, T, Nu = 2, 8, 438, 16
    key = jax.random.PRNGKey(0)
    kx, kp = jax.random.split(key)

    x = jax.random.normal(kx, (B, C, T), jnp.float32)
    raw, folded = init_params(kp, C=C, Nu=Nu, T=T)

    out = sccnet_forward(x, folded)       # B=2 -> block_b=1, grid=(2,)
    out = jax.block_until_ready(out)
    assert out.shape == (B, N_CLS)

    ref = reference_forward(x, raw)
    # Tolerance covers the bf16 MXU inputs on the conv1 / conv2 / avg-pool matmuls
    # (all accumulation in f32); observed error is well inside this bound.
    assert jnp.allclose(out, ref, rtol=4e-2, atol=4e-2), (out, ref)

    print("KERNEL_OK")
</pallas_src>

<mosaic_0001>
module attributes {stable_mosaic.version = 11 : i64} {
  func.func @probe(%arg0: memref<16x512xbf16, #tpu.memory_space<vmem>>, %arg1: memref<16x512xbf16, #tpu.memory_space<vmem>>) attributes {dimension_semantics = [], scalar_prefetch = 0 : i64, scratch_operands = 0 : i64, tpu.core_type = #tpu.core_type<tc>} {
    %c0 = arith.constant 0 : index
    %c0_0 = arith.constant 0 : index
    %0 = vector.load %arg0[%c0, %c0_0] : memref<16x512xbf16, #tpu.memory_space<vmem>>, vector<16x512xbf16>
    %c1_i32 = arith.constant 1 : i32
    %1 = tpu.dynamic_rotate %0 by %c1_i32 dim 1 : vector<16x512xbf16>, i32 -> vector<16x512xbf16>
    %c0_1 = arith.constant 0 : index
    %c0_2 = arith.constant 0 : index
    %2 = vector.load %arg1[%c0_1, %c0_2] : memref<16x512xbf16, #tpu.memory_space<vmem>>, vector<16x512xbf16>
    tpu.vector_store %arg1[%c0_1, %c0_2], %1 {strides = array<i32>} : memref<16x512xbf16, #tpu.memory_space<vmem>>, vector<16x512xbf16>,
    return
  }
}

module attributes {stable_mosaic.version = 11 : i64} {
  func.func @sccnet_kernel(%arg0: i32, %arg1: memref<1x8x512xbf16, #tpu.memory_space<vmem>>, %arg2: memref<16x8xbf16, #tpu.memory_space<vmem>>, %arg3: memref<16x1xf32, #tpu.memory_space<vmem>>, %arg4: memref<16x512xf32, #tpu.memory_space<vmem>>, %arg5: memref<20x192xbf16, #tpu.memory_space<vmem>>, %arg6: memref<20x1xf32, #tpu.memory_space<vmem>>, %arg7: memref<20x1xf32, #tpu.memory_space<vmem>>, %arg8: memref<512x32xbf16, #tpu.memory_space<vmem>>, %arg9: memref<80x32xf32, #tpu.memory_space<vmem>>, %arg10: memref<32x1xf32, #tpu.memory_space<vmem>>, %arg11: memref<4x1xf32, #tpu.memory_space<vmem>>, %arg12: memref<1x4x1xf32, #tpu.memory_space<vmem>>, %arg13: memref<192x512xbf16, #tpu.memory_space<vmem>>) attributes {dimension_semantics = [#tpu.dimension_semantics<parallel>], iteration_bounds = array<i64: 2>, scalar_prefetch = 0 : i64, scratch_operands = 1 : i64, tpu.core_type = #tpu.core_type<tc>, window_params = [{transform_indices = @transform_0, window_bounds = array<i64: 1, 8, 512>}, {pipeline_mode = #tpu.pipeline_mode<synchronous>, transform_indices = @transform_1, window_bounds = array<i64: 16, 8>}, {pipeline_mode = #tpu.pipeline_mode<synchronous>, transform_indices = @transform_2, window_bounds = array<i64: 16, 1>}, {pipeline_mode = #tpu.pipeline_mode<synchronous>, transform_indices = @transform_3, window_bounds = array<i64: 16, 512>}, {pipeline_mode = #tpu.pipeline_mode<synchronous>, transform_indices = @transform_4, window_bounds = array<i64: 20, 192>}, {pipeline_mode = #tpu.pipeline_mode<synchronous>, transform_indices = @transform_5, window_bounds = array<i64: 20, 1>}, {pipeline_mode = #tpu.pipeline_mode<synchronous>, transform_indices = @transform_6, window_bounds = array<i64: 20, 1>}, {pipeline_mode = #tpu.pipeline_mode<synchronous>, transform_indices = @transform_7, window_bounds = array<i64: 512, 32>}, {pipeline_mode = #tpu.pipeline_mode<synchronous>, transform_indices = @transform_8, window_bounds = array<i64: 80, 32>}, {pipeline_mode = #tpu.pipeline_mode<synchronous>, transform_indices = @transform_9, window_bounds = array<i64: 32, 1>}, {pipeline_mode = #tpu.pipeline_mode<synchronous>, transform_indices = @transform_10, window_bounds = array<i64: 4, 1>}, {transform_indices = @transform_11, window_bounds = array<i64: 1, 4, 1>}]} {
    %c0 = arith.constant 0 : index
    %c0_0 = arith.constant 0 : index
    %0 = vector.load %arg2[%c0, %c0_0] : memref<16x8xbf16, #tpu.memory_space<vmem>>, vector<16x8xbf16>
    %c0_1 = arith.constant 0 : index
    %c0_2 = arith.constant 0 : index
    %c0_3 = arith.constant 0 : index
    %1 = vector.load %arg1[%c0_1, %c0_2, %c0_3] : memref<1x8x512xbf16, #tpu.memory_space<vmem>>, vector<1x8x512xbf16>
    %2 = vector.shape_cast %1 : vector<1x8x512xbf16> to vector<8x512xbf16>
    %cst = arith.constant dense<0.000000e+00> : vector<16x512xf32>
    %3 = tpu.matmul %0, %2, %cst {dimension_numbers = #tpu.dot_dimension_numbers<[1], [0], [0], [1], [0, 0, 1, 1], [], []>} : vector<16x8xbf16>, vector<8x512xbf16>, vector<16x512xf32> -> vector<16x512xf32>
    %c0_4 = arith.constant 0 : index
    %c0_5 = arith.constant 0 : index
    %4 = vector.load %arg3[%c0_4, %c0_5] : memref<16x1xf32, #tpu.memory_space<vmem>>, vector<16x1xf32>
    %5 = vector.broadcast %4 : vector<16x1xf32> to vector<16x512xf32>
    %6 = arith.mulf %5, %3 : vector<16x512xf32>
    %c0_6 = arith.constant 0 : index
    %c0_7 = arith.constant 0 : index
    %7 = vector.load %arg4[%c0_6, %c0_7] : memref<16x512xf32, #tpu.memory_space<vmem>>, vector<16x512xf32>
    %8 = arith.addf %6, %7 : vector<16x512xf32>
    %9 = arith.truncf %8 : vector<16x512xf32> to vector<16x512xbf16>
    %c0_8 = arith.constant 0 : index
    %c0_9 = arith.constant 0 : index
    %10 = vector.load %arg13[%c0_8, %c0_9] : memref<192x512xbf16, #tpu.memory_space<vmem>>, vector<16x512xbf16>
    tpu.vector_store %arg13[%c0_8, %c0_9], %9 {strides = array<i32>} : memref<192x512xbf16, #tpu.memory_space<vmem>>, vector<16x512xbf16>,
    %11 = vector.extract_strided_slice %9 {offsets = [0, 1], sizes = [16, 511], strides = [1, 1]} : vector<16x512xbf16> to vector<16x511xbf16>
    %12 = vector.extract_strided_slice %9 {offsets = [0, 0], sizes = [16, 1], strides = [1, 1]} : vector<16x512xbf16> to vector<16x1xbf16>
    %13 = tpu.concatenate %11, %12 in 1 : vector<16x511xbf16>, vector<16x1xbf16> -> vector<16x512xbf16>
    %c16 = arith.constant 16 : index
    %c0_10 = arith.constant 0 : index
    %14 = vector.load %arg13[%c16, %c0_10] : memref<192x512xbf16, #tpu.memory_space<vmem>>, vector<16x512xbf16>
    tpu.vector_store %arg13[%c16, %c0_10], %13 {strides = array<i32>} : memref<192x512xbf16, #tpu.memory_space<vmem>>, vector<16x512xbf16>,
    %15 = vector.extract_strided_slice %9 {offsets = [0, 2], sizes = [16, 510], strides = [1, 1]} : vector<16x512xbf16> to vector<16x510xbf16>
    %16 = vector.extract_strided_slice %9 {offsets = [0, 0], sizes = [16, 2], strides = [1, 1]} : vector<16x512xbf16> to vector<16x2xbf16>
    %17 = tpu.concatenate %15, %16 in 1 : vector<16x510xbf16>, vector<16x2xbf16> -> vector<16x512xbf16>
    %c32 = arith.constant 32 : index
    %c0_11 = arith.constant 0 : index
    %18 = vector.load %arg13[%c32, %c0_11] : memref<192x512xbf16, #tpu.memory_space<vmem>>, vector<16x512xbf16>
    tpu.vector_store %arg13[%c32, %c0_11], %17 {strides = array<i32>} : memref<192x512xbf16, #tpu.memory_space<vmem>>, vector<16x512xbf16>,
    %19 = vector.extract_strided_slice %9 {offsets = [0, 3], sizes = [16, 509], strides = [1, 1]} : vector<16x512xbf16> to vector<16x509xbf16>
    %20 = vector.extract_strided_slice %9 {offsets = [0, 0], sizes = [16, 3], strides = [1, 1]} : vector<16x512xbf16> to vector<16x3xbf16>
    %21 = tpu.concatenate %19, %20 in 1 : vector<16x509xbf16>, vector<16x3xbf16> -> vector<16x512xbf16>
    %c48 = arith.constant 48 : index
    %c0_12 = arith.constant 0 : index
    %22 = vector.load %arg13[%c48, %c0_12] : memref<192x512xbf16, #tpu.memory_space<vmem>>, vector<16x512xbf16>
    tpu.vector_store %arg13[%c48, %c0_12], %21 {strides = array<i32>} : memref<192x512xbf16, #tpu.memory_space<vmem>>, vector<16x512xbf16>,
    %23 = vector.extract_strided_slice %9 {offsets = [0, 4], sizes = [16, 508], strides = [1, 1]} : vector<16x512xbf16> to vector<16x508xbf16>
    %24 = vector.extract_strided_slice %9 {offsets = [0, 0], sizes = [16, 4], strides = [1, 1]} : vector<16x512xbf16> to vector<16x4xbf16>
    %25 = tpu.concatenate %23, %24 in 1 : vector<16x508xbf16>, vector<16x4xbf16> -> vector<16x512xbf16>
    %c64 = arith.constant 64 : index
    %c0_13 = arith.constant 0 : index
    %26 = vector.load %arg13[%c64, %c0_13] : memref<192x512xbf16, #tpu.memory_space<vmem>>, vector<16x512xbf16>
    tpu.vector_store %arg13[%c64, %c0_13], %25 {strides = array<i32>} : memref<192x512xbf16, #tpu.memory_space<vmem>>, vector<16x512xbf16>,
    %27 = vector.extract_strided_slice %9 {offsets = [0, 5], sizes = [16, 507], strides = [1, 1]} : vector<16x512xbf16> to vector<16x507xbf16>
    %28 = vector.extract_strided_slice %9 {offsets = [0, 0], sizes = [16, 5], strides = [1, 1]} : vector<16x512xbf16> to vector<16x5xbf16>
    %29 = tpu.concatenate %27, %28 in 1 : vector<16x507xbf16>, vector<16x5xbf16> -> vector<16x512xbf16>
    %c80 = arith.constant 80 : index
    %c0_14 = arith.constant 0 : index
    %30 = vector.load %arg13[%c80, %c0_14] : memref<192x512xbf16, #tpu.memory_space<vmem>>, vector<16x512xbf16>
    tpu.vector_store %arg13[%c80, %c0_14], %29 {strides = array<i32>} : memref<192x512xbf16, #tpu.memory_space<vmem>>, vector<16x512xbf16>,
    %31 = vector.extract_strided_slice %9 {offsets = [0, 6], sizes = [16, 506], strides = [1, 1]} : vector<16x512xbf16> to vector<16x506xbf16>
    %32 = vector.extract_strided_slice %9 {offsets = [0, 0], sizes = [16, 6], strides = [1, 1]} : vector<16x512xbf16> to vector<16x6xbf16>
    %33 = tpu.concatenate %31, %32 in 1 : vector<16x506xbf16>, vector<16x6xbf16> -> vector<16x512xbf16>
    %c96 = arith.constant 96 : index
    %c0_15 = arith.constant 0 : index
    %34 = vector.load %arg13[%c96, %c0_15] : memref<192x512xbf16, #tpu.memory_space<vmem>>, vector<16x512xbf16>
    tpu.vector_store %arg13[%c96, %c0_15], %33 {strides = array<i32>} : memref<192x512xbf16, #tpu.memory_space<vmem>>, vector<16x512xbf16>,
    %35 = vector.extract_strided_slice %9 {offsets = [0, 7], sizes = [16, 505], strides = [1, 1]} : vector<16x512xbf16> to vector<16x505xbf16>
    %36 = vector.extract_strided_slice %9 {offsets = [0, 0], sizes = [16, 7], strides = [1, 1]} : vector<16x512xbf16> to vector<16x7xbf16>
    %37 = tpu.concatenate %35, %36 in 1 : vector<16x505xbf16>, vector<16x7xbf16> -> vector<16x512xbf16>
    %c112 = arith.constant 112 : index
    %c0_16 = arith.constant 0 : index
    %38 = vector.load %arg13[%c112, %c0_16] : memref<192x512xbf16, #tpu.memory_space<vmem>>, vector<16x512xbf16>
    tpu.vector_store %arg13[%c112, %c0_16], %37 {strides = array<i32>} : memref<192x512xbf16, #tpu.memory_space<vmem>>, vector<16x512xbf16>,
    %39 = vector.extract_strided_slice %9 {offsets = [0, 8], sizes = [16, 504], strides = [1, 1]} : vector<16x512xbf16> to vector<16x504xbf16>
    %40 = vector.extract_strided_slice %9 {offsets = [0, 0], sizes = [16, 8], strides = [1, 1]} : vector<16x512xbf16> to vector<16x8xbf16>
    %41 = tpu.concatenate %39, %40 in 1 : vector<16x504xbf16>, vector<16x8xbf16> -> vector<16x512xbf16>
    %c128 = arith.constant 128 : index
    %c0_17 = arith.constant 0 : index
    %42 = vector.load %arg13[%c128, %c0_17] : memref<192x512xbf16, #tpu.memory_space<vmem>>, vector<16x512xbf16>
    tpu.vector_store %arg13[%c128, %c0_17], %41 {strides = array<i32>} : memref<192x512xbf16, #tpu.memory_space<vmem>>, vector<16x512xbf16>,
    %43 = vector.extract_strided_slice %9 {offsets = [0, 9], sizes = [16, 503], strides = [1, 1]} : vector<16x512xbf16> to vector<16x503xbf16>
    %44 = vector.extract_strided_slice %9 {offsets = [0, 0], sizes = [16, 9], strides = [1, 1]} : vector<16x512xbf16> to vector<16x9xbf16>
    %45 = tpu.concatenate %43, %44 in 1 : vector<16x503xbf16>, vector<16x9xbf16> -> vector<16x512xbf16>
    %c144 = arith.constant 144 : index
    %c0_18 = arith.constant 0 : index
    %46 = vector.load %arg13[%c144, %c0_18] : memref<192x512xbf16, #tpu.memory_space<vmem>>, vector<16x512xbf16>
    tpu.vector_store %arg13[%c144, %c0_18], %45 {strides = array<i32>} : memref<192x512xbf16, #tpu.memory_space<vmem>>, vector<16x512xbf16>,
    %47 = vector.extract_strided_slice %9 {offsets = [0, 10], sizes = [16, 502], strides = [1, 1]} : vector<16x512xbf16> to vector<16x502xbf16>
    %48 = vector.extract_strided_slice %9 {offsets = [0, 0], sizes = [16, 10], strides = [1, 1]} : vector<16x512xbf16> to vector<16x10xbf16>
    %49 = tpu.concatenate %47, %48 in 1 : vector<16x502xbf16>, vector<16x10xbf16> -> vector<16x512xbf16>
    %c160 = arith.constant 160 : index
    %c0_19 = arith.constant 0 : index
    %50 = vector.load %arg13[%c160, %c0_19] : memref<192x512xbf16, #tpu.memory_space<vmem>>, vector<16x512xbf16>
    tpu.vector_store %arg13[%c160, %c0_19], %49 {strides = array<i32>} : memref<192x512xbf16, #tpu.memory_space<vmem>>, vector<16x512xbf16>,
    %51 = vector.extract_strided_slice %9 {offsets = [0, 11], sizes = [16, 501], strides = [1, 1]} : vector<16x512xbf16> to vector<16x501xbf16>
    %52 = vector.extract_strided_slice %9 {offsets = [0, 0], sizes = [16, 11], strides = [1, 1]} : vector<16x512xbf16> to vector<16x11xbf16>
    %53 = tpu.concatenate %51, %52 in 1 : vector<16x501xbf16>, vector<16x11xbf16> -> vector<16x512xbf16>
    %c176 = arith.constant 176 : index
    %c0_20 = arith.constant 0 : index
    %54 = vector.load %arg13[%c176, %c0_20] : memref<192x512xbf16, #tpu.memory_space<vmem>>, vector<16x512xbf16>
    tpu.vector_store %arg13[%c176, %c0_20], %53 {strides = array<i32>} : memref<192x512xbf16, #tpu.memory_space<vmem>>, vector<16x512xbf16>,
    %c0_21 = arith.constant 0 : index
    %c0_22 = arith.constant 0 : index
    %55 = vector.load %arg5[%c0_21, %c0_22] : memref<20x192xbf16, #tpu.memory_space<vmem>>, vector<20x192xbf16>
    %c0_23 = arith.constant 0 : index
    %c0_24 = arith.constant 0 : index
    %56 = vector.load %arg13[%c0_23, %c0_24] : memref<192x512xbf16, #tpu.memory_space<vmem>>, vector<192x512xbf16>
    %cst_25 = arith.constant dense<0.000000e+00> : vector<20x512xf32>
    %57 = tpu.matmul %55, %56, %cst_25 {dimension_numbers = #tpu.dot_dimension_numbers<[1], [0], [0], [1], [0, 0, 1, 1], [], []>} : vector<20x192xbf16>, vector<192x512xbf16>, vector<20x512xf32> -> vector<20x512xf32>
    %c0_26 = arith.constant 0 : index
    %c0_27 = arith.constant 0 : index
    %58 = vector.load %arg6[%c0_26, %c0_27] : memref<20x1xf32, #tpu.memory_space<vmem>>, vector<20x1xf32>
    %59 = vector.broadcast %58 : vector<20x1xf32> to vector<20x512xf32>
    %60 = arith.mulf %59, %57 : vector<20x512xf32>
    %c0_28 = arith.constant 0 : index
    %c0_29 = arith.constant 0 : index
    %61 = vector.load %arg7[%c0_28, %c0_29] : memref<20x1xf32, #tpu.memory_space<vmem>>, vector<20x1xf32>
    %62 = vector.broadcast %61 : vector<20x1xf32> to vector<20x512xf32>
    %63 = arith.addf %60, %62 : vector<20x512xf32>
    %64 = arith.mulf %63, %63 : vector<20x512xf32>
    %65 = arith.truncf %64 : vector<20x512xf32> to vector<20x512xbf16>
    %c0_30 = arith.constant 0 : index
    %c0_31 = arith.constant 0 : index
    %66 = vector.load %arg8[%c0_30, %c0_31] : memref<512x32xbf16, #tpu.memory_space<vmem>>, vector<512x32xbf16>
    %cst_32 = arith.constant dense<0.000000e+00> : vector<20x32xf32>
    %67 = tpu.matmul %65, %66, %cst_32 {dimension_numbers = #tpu.dot_dimension_numbers<[1], [0], [0], [1], [0, 0, 1, 1], [], []>} : vector<20x512xbf16>, vector<512x32xbf16>, vector<20x32xf32> -> vector<20x32xf32>
    %cst_33 = arith.constant 0.0161290318 : f32
    %68 = vector.broadcast %cst_33 : f32 to vector<20x32xf32>
    %69 = arith.mulf %67, %68 : vector<20x32xf32>
    %cst_34 = arith.constant 9.99999991E-38 : f32
    %70 = vector.broadcast %cst_34 : f32 to vector<20x32xf32>
    %71 = arith.maximumf %69, %70 : vector<20x32xf32>
    %72 = math.log %71 : vector<20x32xf32>
    %73 = tpu.concatenate %72, %72, %72, %72 in 0 : vector<20x32xf32>, vector<20x32xf32>, vector<20x32xf32>, vector<20x32xf32> -> vector<80x32xf32>
    %c0_35 = arith.constant 0 : index
    %c0_36 = arith.constant 0 : index
    %74 = vector.load %arg9[%c0_35, %c0_36] : memref<80x32xf32, #tpu.memory_space<vmem>>, vector<80x32xf32>
    %75 = arith.mulf %73, %74 : vector<80x32xf32>
    %c0_37 = arith.constant 0 : index
    %c0_38 = arith.constant 0 : index
    %76 = vector.load %arg10[%c0_37, %c0_38] : memref<32x1xf32, #tpu.memory_space<vmem>>, vector<32x1xf32>
    %cst_39 = arith.constant dense<0.000000e+00> : vector<80x1xf32>
    %77 = tpu.matmul %75, %76, %cst_39 {dimension_numbers = #tpu.dot_dimension_numbers<[1], [0], [0], [1], [0, 0, 1, 1], [], []>} : vector<80x32xf32>, vector<32x1xf32>, vector<80x1xf32> -> vector<80x1xf32>
    %78 = vector.extract_strided_slice %77 {offsets = [0, 0], sizes = [20, 1], strides = [1, 1]} : vector<80x1xf32> to vector<20x1xf32>
    %cst_40 = arith.constant dense<0.000000e+00> : vector<1xf32>
    %79 = vector.multi_reduction <add>, %78, %cst_40 [0] : vector<20x1xf32> to vector<1xf32>
    %80 = vector.shape_cast %79 : vector<1xf32> to vector<1x1xf32>
    %81 = vector.extract_strided_slice %77 {offsets = [20, 0], sizes = [20, 1], strides = [1, 1]} : vector<80x1xf32> to vector<20x1xf32>
    %cst_41 = arith.constant dense<0.000000e+00> : vector<1xf32>
    %82 = vector.multi_reduction <add>, %81, %cst_41 [0] : vector<20x1xf32> to vector<1xf32>
    %83 = vector.shape_cast %82 : vector<1xf32> to vector<1x1xf32>
    %84 = vector.extract_strided_slice %77 {offsets = [40, 0], sizes = [20, 1], strides = [1, 1]} : vector<80x1xf32> to vector<20x1xf32>
    %cst_42 = arith.constant dense<0.000000e+00> : vector<1xf32>
    %85 = vector.multi_reduction <add>, %84, %cst_42 [0] : vector<20x1xf32> to vector<1xf32>
    %86 = vector.shape_cast %85 : vector<1xf32> to vector<1x1xf32>
    %87 = vector.extract_strided_slice %77 {offsets = [60, 0], sizes = [20, 1], strides = [1, 1]} : vector<80x1xf32> to vector<20x1xf32>
    %cst_43 = arith.constant dense<0.000000e+00> : vector<1xf32>
    %88 = vector.multi_reduction <add>, %87, %cst_43 [0] : vector<20x1xf32> to vector<1xf32>
    %89 = vector.shape_cast %88 : vector<1xf32> to vector<1x1xf32>
    %90 = tpu.concatenate %80, %83, %86, %89 in 0 : vector<1x1xf32>, vector<1x1xf32>, vector<1x1xf32>, vector<1x1xf32> -> vector<4x1xf32>
    %c0_44 = arith.constant 0 : index
    %c0_45 = arith.constant 0 : index
    %91 = vector.load %arg11[%c0_44, %c0_45] : memref<4x1xf32, #tpu.memory_space<vmem>>, vector<4x1xf32>
    %92 = arith.addf %90, %91 : vector<4x1xf32>
    %c0_46 = arith.constant 0 : index
    %c0_47 = arith.constant 0 : index
    %c0_48 = arith.constant 0 : index
    %93 = vector.load %arg12[%c0_46, %c0_47, %c0_48] : memref<1x4x1xf32, #tpu.memory_space<vmem>>, vector<1x4x1xf32>
    %94 = vector.shape_cast %93 : vector<1x4x1xf32> to vector<4x1xf32>
    %95 = vector.shape_cast %92 : vector<4x1xf32> to vector<1x4x1xf32>
    tpu.vector_store %arg12[%c0_46, %c0_47, %c0_48], %95 {strides = array<i32>} : memref<1x4x1xf32, #tpu.memory_space<vmem>>, vector<1x4x1xf32>,
    return
  }
  func.func @transform_0(%arg0: i32) -> (i32, i32, i32) {
    %c0_i32 = arith.constant 0 : i32
    %c0_i32_0 = arith.constant 0 : i32
    %c0_i32_1 = arith.constant 0 : i32
    return %arg0, %c0_i32, %c0_i32_0 : i32, i32, i32
  }
  func.func @transform_1(%arg0: i32) -> (i32, i32) {
    %c0_i32 = arith.constant 0 : i32
    %c0_i32_0 = arith.constant 0 : i32
    %c0_i32_1 = arith.constant 0 : i32
    return %c0_i32, %c0_i32_0 : i32, i32
  }
  func.func @transform_2(%arg0: i32) -> (i32, i32) {
    %c0_i32 = arith.constant 0 : i32
    %c0_i32_0 = arith.constant 0 : i32
    %c0_i32_1 = arith.constant 0 : i32
    return %c0_i32, %c0_i32_0 : i32, i32
  }
  func.func @transform_3(%arg0: i32) -> (i32, i32) {
    %c0_i32 = arith.constant 0 : i32
    %c0_i32_0 = arith.constant 0 : i32
    %c0_i32_1 = arith.constant 0 : i32
    return %c0_i32, %c0_i32_0 : i32, i32
  }
  func.func @transform_4(%arg0: i32) -> (i32, i32) {
    %c0_i32 = arith.constant 0 : i32
    %c0_i32_0 = arith.constant 0 : i32
    %c0_i32_1 = arith.constant 0 : i32
    return %c0_i32, %c0_i32_0 : i32, i32
  }
  func.func @transform_5(%arg0: i32) -> (i32, i32) {
    %c0_i32 = arith.constant 0 : i32
    %c0_i32_0 = arith.constant 0 : i32
    %c0_i32_1 = arith.constant 0 : i32
    return %c0_i32, %c0_i32_0 : i32, i32
  }
  func.func @transform_6(%arg0: i32) -> (i32, i32) {
    %c0_i32 = arith.constant 0 : i32
    %c0_i32_0 = arith.constant 0 : i32
    %c0_i32_1 = arith.constant 0 : i32
    return %c0_i32, %c0_i32_0 : i32, i32
  }
  func.func @transform_7(%arg0: i32) -> (i32, i32) {
    %c0_i32 = arith.constant 0 : i32
    %c0_i32_0 = arith.constant 0 : i32
    %c0_i32_1 = arith.constant 0 : i32
    return %c0_i32, %c0_i32_0 : i32, i32
  }
  func.func @transform_8(%arg0: i32) -> (i32, i32) {
    %c0_i32 = arith.constant 0 : i32
    %c0_i32_0 = arith.constant 0 : i32
    %c0_i32_1 = arith.constant 0 : i32
    return %c0_i32, %c0_i32_0 : i32, i32
  }
  func.func @transform_9(%arg0: i32) -> (i32, i32) {
    %c0_i32 = arith.constant 0 : i32
    %c0_i32_0 = arith.constant 0 : i32
    %c0_i32_1 = arith.constant 0 : i32
    return %c0_i32, %c0_i32_0 : i32, i32
  }
  func.func @transform_10(%arg0: i32) -> (i32, i32) {
    %c0_i32 = arith.constant 0 : i32
    %c0_i32_0 = arith.constant 0 : i32
    %c0_i32_1 = arith.constant 0 : i32
    return %c0_i32, %c0_i32_0 : i32, i32
  }
  func.func @transform_11(%arg0: i32) -> (i32, i32, i32) {
    %c0_i32 = arith.constant 0 : i32
    %c0_i32_0 = arith.constant 0 : i32
    %c0_i32_1 = arith.constant 0 : i32
    return %arg0, %c0_i32, %c0_i32_0 : i32, i32, i32
  }
}

</mosaic_0001>

<bundles_post_ra>
// kernel: tpu_custom_call.1
= control target key start
LH: loop header
LB: loop body
LE: loop exit
PB: predicated region body
PF: predicated region fallthrough
CT: control target
= control target key end

     0   :  { %s2076_s17 = smov 0   ;;  %s2368_s0 = inlined_call_operand.vmem [shape: bf16[2,8,512], index: 0, kind: input, shape index: {}]   ;;  %s2369_s1 = inlined_call_operand.vmem [shape: bf16[16,8], index: 1, kind: input, shape index: {}]   ;;  %s2370_s2 = inlined_call_operand.vmem [shape: f32[16,1], index: 2, kind: input, shape index: {}]   ;;  %s2371_s3 = inlined_call_operand.vmem [shape: f32[16,512], index: 3, kind: input, shape index: {}]   ;;  %s2372_s4 = inlined_call_operand.vmem [shape: bf16[20,192], index: 4, kind: input, shape index: {}]   ;;  %s2373_s5 = inlined_call_operand.vmem [shape: f32[20,1], index: 5, kind: input, shape index: {}]   ;;  %s2374_s6 = inlined_call_operand.vmem [shape: f32[20,1], index: 6, kind: input, shape index: {}]   ;;  %s2375_s7 = inlined_call_operand.vmem [shape: bf16[512,32], index: 7, kind: input, shape index: {}]   ;;  %s2376_s8 = inlined_call_operand.vmem [shape: f32[80,32], index: 8, kind: input, shape index: {}]   ;;  %s2377_s9 = inlined_call_operand.vmem [shape: f32[32,1], index: 9, kind: input, shape index: {}]   ;;  %s2378_s10 = inlined_call_operand.vmem [shape: f32[4,1], index: 10, kind: input, shape index: {}]   ;;  %s2379_s11 = inlined_call_operand.vmem [shape: f32[2,4,1], index: 11, kind: output, shape index: {}]  }
   0x1 LB: > { %s1751_s18 = sadd.s32 4294967295, %s2002_s17   ;;  %p1755_p0 = scmp.ge.s32.totalorder %s2002_s17, 1  ;;  %s2002_s17 = sphi %s2076_s17, %s21_s17  }
   0x2   : > { %p337_p1 = scmp.lt.s32.totalorder %s2002_s17, 3 }
   0x4   : > { %p338_p2 = pnand %p1755_p0, %p337_p1 }
   0x5   : > { %p376_p3 = scmp.lt.s32.totalorder (!%p338_p2), %s1751_s18, 1  ;;  %v2004_v0 = vmov (!%p338_p2), 0   ;;  %v508_v1 = vld [vmem:[%s2370_s2] sm:$0xff] (!%p338_p2)  ;;  %v509_v2 = vld [vmem:[%s2370_s2 + $0x8] sm:$0xff] (!%p338_p2)  ;;  %vm409_vm0 = vcmask (!%p338_p2), 1043456   ;;  %vm405_vm1 = vcmask (!%p338_p2), 64512  }
   0x6   : > { %341 = sbr.rel (%p338_p2) target bundleno = 1164 (0x48c), region = 64  ;;  %454 = vmatprep.mubr.bf16.mxu0 (!%p338_p2), %v2004_v0  ;;  %497 = vmatprep.mubr.bf16.mxu1 (!%p338_p2), %v2004_v0  ;;  %v1952_v9 = vld [vmem:[%s2369_s1] sm:$0xff] (!%p338_p2)   ;;  %v530_v19 = vld [vmem:[%s2371_s3 + $0x10] sm:$0xff] (!%p338_p2)  ;;  %v529_v23 = vld [vmem:[%s2371_s3 + $0x8] sm:$0xff] (!%p338_p2)  ;;  %s2005_s28 = smov (!%p338_p2), 127   ;;  %vm886_vm2 = vcmask (!%p338_p2), 523264  }
   0x7   : > { %1946 = vset.pattern.permute.xlu0 (!%p338_p2), %v2004_v0  ;;  %1947 = vset.pattern.permute.xlu1 (!%p338_p2), %v2004_v0  ;;  %v528_v17 = vld [vmem:[%s2371_s3] sm:$0xff] (!%p338_p2)  ;;  %v534_v28 = vld [vmem:[%s2371_s3 + $0x30] sm:$0xff] (!%p338_p2)  ;;  %v531_v29 = vld [vmem:[%s2371_s3 + $0x18] sm:$0xff] (!%p338_p2)  ;;  %s2006_s29 = smov (!%p338_p2), 126   ;;  %s2007_s30 = smov (!%p338_p2), 125   ;;  %vm564_vm3 = vcmask (!%p338_p2), 1039360  }
   0x8   : > { %512 = vperm.xlu0 (!%p338_p2), %1946, %v508_v1   ;;  %v532_v26 = vld [vmem:[%s2371_s3 + $0x20] sm:$0xff] (!%p338_p2)  ;;  %v533_v33 = vld [vmem:[%s2371_s3 + $0x28] sm:$0xff] (!%p338_p2)  ;;  %v535_v35 = vld [vmem:[%s2371_s3 + $0x38] sm:$0xff] (!%p338_p2)  ;;  %s2008_s12 = smov (!%p338_p2), 124   ;;  %s2009_s13 = smov (!%p338_p2), 123   ;;  %vm588_vm4 = vcmask (!%p338_p2), 1031168  }
   0x9   : > { %s2010_s14 = smov (!%p338_p2), 122   ;;  %s2011_s15 = smov (!%p338_p2), 121   ;;  %v1953_v50 = vld [vmem:[%s2372_s4 + $0x4] ss:$8 sps:$4 sm:$0xff] (!%p338_p2)   ;;  %v997_v53 = vld [vmem:[%s2373_s5 + $0x10] sm:$0xf] (!%p338_p2) }
   0xa   : > { %s2012_s16 = smov (!%p338_p2), 120   ;;  %s2013_s19 = smov (!%p338_p2), 119   ;;  %v995_v51 = vld [vmem:[%s2373_s5] sm:$0xff] (!%p338_p2)  ;;  %v996_v54 = vld [vmem:[%s2373_s5 + $0x8] sm:$0xff] (!%p338_p2)  ;;  %v1027_v56 = vld [vmem:[%s2374_s6 + $0x10] sm:$0xf] (!%p338_p2) }
   0xb   : > { %s2014_s20 = smov (!%p338_p2), 118   ;;  %s2015_s23 = smov (!%p338_p2), 117   ;;  %v1025_v52 = vld [vmem:[%s2374_s6] sm:$0xff] (!%p338_p2)  ;;  %v1026_v55 = vld [vmem:[%s2374_s6 + $0x8] sm:$0xff] (!%p338_p2)  ;;  %vm612_vm5 = vcmask (!%p338_p2), 1022976   ;;  %vm636_vm6 = vcmask (!%p338_p2), 1014784  }
   0xc   : > { %517 = vperm.xlu0 (!%p338_p2), %1946, %v509_v2   ;;  %vm660_vm7 = vcmask (!%p338_p2), 1006592   ;;  %vm684_vm8 = vcmask (!%p338_p2), 998400   ;;  %vm708_vm9 = vcmask (!%p338_p2), 990208   ;;  %vm732_vm10 = vcmask (!%p338_p2), 982016  }
   0xd   : > { %s2381_s18 = smov (!%p376_p3, %s1751_s18), 1  ;;  %vm756_vm11 = vcmask 973824   ;;  %vm780_vm12 = vcmask 965632   ;;  %vm804_vm13 = vcmask 957440   ;;  %vm1475_vm14 = vcmask 261120  }
   0xe   : > { %s1820_s21 = sshll.u32 %s2381_s18, 4  ;;  %vm1621_vm15 = vcmask 7168  }
   0xf   : > { %s380_s26 = scalar_lea.vmem %s2368_s0, %s1820_s21 }
  0x10   : > { %v388_v3 = vld [vmem:[%s380_s26] sm:$0xff]  ;;  %v389_v4 = vld [vmem:[%s380_s26 + $0x8] sm:$0xff] }
  0x11   : > { %v1761_v5 = vcombine.high %v388_v3, %v388_v3  ;;  %v1763_v6 = vcombine.high %v389_v4, %v389_v4  ;;  %v1760_v7 = vcombine.low %v388_v3, %v388_v3  ;;  %v1762_v8 = vcombine.low %v389_v4, %v389_v4 }
  0x13   : > { %1764 = vmatprep.subr.msk.bf16.mxu0 %vm409_vm0, %v1761_v5  ;;  %1766 = vmatprep.subr.msk.bf16.mxu1 %vm409_vm0, %v1763_v6  ;;  %v411_v10 = vsel %vm409_vm0, %v1760_v7, 0  ;;  %v417_v11 = vsel %vm409_vm0, %v1762_v8, 0 }
  0x14   : > { %423 = vmatpush1.bf16.msra.mxu0 %v411_v10  ;;  %466 = vmatpush1.bf16.msra.mxu1 %v417_v11 }
  0x17   : > { %1765 = vmatmul.mubr.msk.bf16.vlgmr.msra.gmra.mrb[0].mxu0 %vm405_vm1, %v1952_v9  ;;  %1767 = vmatmul.mubr.msk.bf16.vlgmr.msra.gmra.mrb[0].mxu1 %vm405_vm1, %v1952_v9  ;;  %vm1625_vm1 = vcmask 3072  }
  0x18   : > { %1772 = vmatprep.mubr.msk.bf16.mxu0 %vm886_vm2, %v1953_v50  ;;  %1774 = vmatprep.mubr.msk.bf16.mxu1 %vm886_vm2, %v1953_v50 }
  0x87   : > { %v513_v12 = vpop.permute.xlu0 %512 }
  0x8b   : > { %v518_v13 = vpop.permute.xlu0 %517 }
  0xea   : > { %v456_v14 = vpop.f32.mrb[0].mxu0  ;;  %v499_v15 = vpop.f32.mrb[0].mxu1 }
  0xeb   : > { %v520_v16 = vmul.f32 %v513_v12, %v456_v14  ;;  %v522_v18 = vmul.f32 %v513_v12, %v499_v15  ;;  %v458_v20 = vpop.f32.mrb[1].mxu0  ;;  %v501_v21 = vpop.f32.mrb[1].mxu1 }
  0xec   : > { %v521_v22 = vmul.f32 %v513_v12, %v458_v20  ;;  %v523_v24 = vmul.f32 %v513_v12, %v501_v21  ;;  %v460_v25 = vpop.f32.mrb[2].mxu0  ;;  %v503_v27 = vpop.f32.mrb[2].mxu1 }
  0xed   : > { %v524_v30 = vmul.f32 %v518_v13, %v460_v25  ;;  %v526_v31 = vmul.f32 %v518_v13, %v503_v27  ;;  %v462_v32 = vpop.f32.mrb[3].mxu0  ;;  %v505_v34 = vpop.f32.mrb[3].mxu1  ;;  %v536_v38 = vadd.f32 %v528_v17, %v520_v16  ;;  %v538_v39 = vadd.f32 %v530_v19, %v522_v18 }
  0xee   : > { %v525_v36 = vmul.f32 %v518_v13, %v462_v32  ;;  %v527_v37 = vmul.f32 %v518_v13, %v505_v34  ;;  %v537_v42 = vadd.f32 %v529_v23, %v521_v22  ;;  %v539_v43 = vadd.f32 %v531_v29, %v523_v24 }
  0xef   : > { %v540_v40 = vadd.f32 %v532_v26, %v524_v30  ;;  %v542_v41 = vadd.f32 %v534_v28, %v526_v31 }
  0xf0   : > { %v541_v44 = vadd.f32 %v533_v33, %v525_v36  ;;  %v543_v45 = vadd.f32 %v535_v35, %v527_v37 }
  0xf1   : > { %v544_v46 = vpack.c.bf16 %v540_v40, %v536_v38  ;;  %v546_v47 = vpack.c.bf16 %v542_v41, %v538_v39 }
  0xf2   : > { %v2127_v48 = vpack.c.bf16 %v541_v44, %v537_v42  ;;  %v2129_v49 = vpack.c.bf16 %v543_v45, %v539_v43 }
  0xf3   : > { %560 = vrot.lane.b32.xlu0 %v546_v47, %s2005_s28  ;;  %556 = vrot.lane.b32.xlu1 %v544_v46, %s2005_s28 }
  0xf4   : > { %893 = vmatprep.subr.bf16.mxu0 %v2127_v48  ;;  %944 = vmatprep.subr.bf16.mxu1 %v2129_v49 }
  0xf5   : > { %894 = vmatpush1.bf16.msra.mxu0 %v544_v46  ;;  %945 = vmatpush1.bf16.msra.mxu1 %v546_v47 }
  0xf7   : > { %580 = vrot.lane.b32.xlu0 %v544_v46, %s2006_s29  ;;  %558 = vrot.lane.b32.xlu1 %v2127_v48, %s2005_s28 }
  0xfb   : > { %584 = vrot.lane.b32.xlu0 %v546_v47, %s2006_s29  ;;  %562 = vrot.lane.b32.xlu1 %v2129_v49, %s2005_s28 }
  0xff   : > { %604 = vrot.lane.b32.xlu0 %v544_v46, %s2007_s30  ;;  %582 = vrot.lane.b32.xlu1 %v2127_v48, %s2006_s29 }
 0x103   : > { %608 = vrot.lane.b32.xlu0 %v546_v47, %s2007_s30  ;;  %586 = vrot.lane.b32.xlu1 %v2129_v49, %s2006_s29 }
 0x107   : > { %628 = vrot.lane.b32.xlu0 %v544_v46, %s2008_s12  ;;  %606 = vrot.lane.b32.xlu1 %v2127_v48, %s2007_s30 }
 0x10b   : > { %632 = vrot.lane.b32.xlu0 %v546_v47, %s2008_s12  ;;  %610 = vrot.lane.b32.xlu1 %v2129_v49, %s2007_s30  ;;  %s1758_s30 = sshll.u32 %s2381_s18, 2 }
 0x10f   : > { %652 = vrot.lane.b32.xlu0 %v544_v46, %s2009_s13  ;;  %630 = vrot.lane.b32.xlu1 %v2127_v48, %s2008_s12 }
 0x113   : > { %656 = vrot.lane.b32.xlu0 %v546_v47, %s2009_s13  ;;  %634 = vrot.lane.b32.xlu1 %v2129_v49, %s2008_s12 }
 0x117   : > { %676 = vrot.lane.b32.xlu0 %v544_v46, %s2010_s14  ;;  %654 = vrot.lane.b32.xlu1 %v2127_v48, %s2009_s13 }
 0x11b   : > { %680 = vrot.lane.b32.xlu0 %v546_v47, %s2010_s14  ;;  %658 = vrot.lane.b32.xlu1 %v2129_v49, %s2009_s13 }
 0x11f   : > { %700 = vrot.lane.b32.xlu0 %v544_v46, %s2011_s15  ;;  %678 = vrot.lane.b32.xlu1 %v2127_v48, %s2010_s14 }
 0x123   : > { %704 = vrot.lane.b32.xlu0 %v546_v47, %s2011_s15  ;;  %682 = vrot.lane.b32.xlu1 %v2129_v49, %s2010_s14 }
 0x127   : > { %724 = vrot.lane.b32.xlu0 %v544_v46, %s2012_s16  ;;  %702 = vrot.lane.b32.xlu1 %v2127_v48, %s2011_s15 }
 0x12b   : > { %728 = vrot.lane.b32.xlu0 %v546_v47, %s2012_s16  ;;  %706 = vrot.lane.b32.xlu1 %v2129_v49, %s2011_s15 }
 0x12f   : > { %748 = vrot.lane.b32.xlu0 %v544_v46, %s2013_s19  ;;  %726 = vrot.lane.b32.xlu1 %v2127_v48, %s2012_s16 }
 0x133   : > { %752 = vrot.lane.b32.xlu0 %v546_v47, %s2013_s19  ;;  %730 = vrot.lane.b32.xlu1 %v2129_v49, %s2012_s16  ;;  %s384_s16 = scalar_lea.vmem %s2379_s11, %s1758_s30 }
 0x137   : > { %772 = vrot.lane.b32.xlu0 %v544_v46, %s2014_s20  ;;  %750 = vrot.lane.b32.xlu1 %v2127_v48, %s2013_s19 }
 0x13b   : > { %776 = vrot.lane.b32.xlu0 %v546_v47, %s2014_s20  ;;  %754 = vrot.lane.b32.xlu1 %v2129_v49, %s2013_s19 }
 0x13f   : > { %796 = vrot.lane.b32.xlu0 %v544_v46, %s2015_s23  ;;  %774 = vrot.lane.b32.xlu1 %v2127_v48, %s2014_s20 }
 0x143   : > { %800 = vrot.lane.b32.xlu0 %v546_v47, %s2015_s23  ;;  %778 = vrot.lane.b32.xlu1 %v2129_v49, %s2014_s20 }
 0x147   : > { %1000 = vperm.xlu0 %1946, %v995_v51   ;;  %798 = vrot.lane.b32.xlu1 %v2127_v48, %s2015_s23 }
 0x14b   : > { %1030 = vperm.xlu0 %1946, %v1025_v52   ;;  %802 = vrot.lane.b32.xlu1 %v2129_v49, %s2015_s23 }
 0x14f   : > { %1010 = vperm.xlu0 %1946, %v997_v53   ;;  %1005 = vperm.xlu1 %1947, %v996_v54  }
 0x153   : > { %1035 = vperm.xlu1 %1947, %v1026_v55  }
 0x157   : > { %1040 = vperm.xlu1 %1947, %v1027_v56  }
 0x165   : > { %v561_v57 = vpop.permute.xlu0 %560  ;;  %v557_v58 = vpop.permute.xlu1 %556 }
 0x169   : > { %v581_v59 = vpop.permute.xlu0 %580  ;;  %v559_v60 = vpop.permute.xlu1 %558 }
 0x16a   : > { %v565_v61 = vsel %vm564_vm3, %v557_v58, %v559_v60  ;;  %v566_v62 = vsel %vm564_vm3, %v559_v60, %v561_v57 }
 0x16b   : > { %895 = vmatprep.subr.bf16.mxu0 %v566_v62 }
 0x16c   : > { %896 = vmatpush1.bf16.msra.mxu0 %v565_v61 }
 0x16d   : > { %v585_v63 = vpop.permute.xlu0 %584  ;;  %v563_v0 = vpop.permute.xlu1 %562 }
 0x16e   : > { %v567_v1 = vsel %vm564_vm3, %v561_v57, %v563_v0  ;;  %v574_v2 = vsel %vm564_vm3, %v563_v0, %v557_v58  ;;  %vm1693_vm3 = vcmask 1042432  }
 0x16f   : > { %946 = vmatprep.subr.bf16.mxu1 %v574_v2 }
 0x170   : > { %947 = vmatpush1.bf16.msra.mxu1 %v567_v1 }
 0x171   : > { %v605_v3 = vpop.permute.xlu0 %604  ;;  %v583_v4 = vpop.permute.xlu1 %582 }
 0x172   : > { %v589_v5 = vsel %vm588_vm4, %v581_v59, %v583_v4  ;;  %v590_v6 = vsel %vm588_vm4, %v583_v4, %v585_v63 }
 0x173   : > { %897 = vmatprep.subr.bf16.mxu0 %v590_v6 }
 0x174   : > { %898 = vmatpush1.bf16.msra.mxu0 %v589_v5 }
 0x175   : > { %v609_v7 = vpop.permute.xlu0 %608  ;;  %v587_v8 = vpop.permute.xlu1 %586 }
 0x176   : > { %v591_v9 = vsel %vm588_vm4, %v585_v63, %v587_v8  ;;  %v598_v10 = vsel %vm588_vm4, %v587_v8, %v581_v59 }
 0x177   : > { %948 = vmatprep.subr.bf16.mxu1 %v598_v10 }
 0x178   : > { %949 = vmatpush1.bf16.msra.mxu1 %v591_v9 }
 0x179   : > { %v629_v11 = vpop.permute.xlu0 %628  ;;  %v607_v12 = vpop.permute.xlu1 %606 }
 0x17a   : > { %v613_v13 = vsel %vm612_vm5, %v605_v3, %v607_v12  ;;  %v614_v14 = vsel %vm612_vm5, %v607_v12, %v609_v7  ;;  %v822_v12 = vld [vmem:[%s2372_s4 + $0x10] sm:$0x33] }
 0x17b   : > { %899 = vmatprep.subr.bf16.mxu0 %v614_v14 }
 0x17c   : > { %900 = vmatpush1.bf16.msra.mxu0 %v613_v13  ;;  %v1958_v13 = vld [vmem:[%s2375_s7 + $0x40] sm:$0xff]  }
 0x17d   : > { %v633_v15 = vpop.permute.xlu0 %632  ;;  %v611_v16 = vpop.permute.xlu1 %610 }
 0x17e   : > { %v615_v17 = vsel %vm612_vm5, %v609_v7, %v611_v16  ;;  %v622_v18 = vsel %vm612_vm5, %v611_v16, %v605_v3  ;;  %v1955_v16 = vld [vmem:[%s2372_s4] ss:$8 sps:$4 sm:$0xff]  }
 0x17f   : > { %950 = vmatprep.subr.bf16.mxu1 %v622_v18 }
 0x180   : > { %951 = vmatpush1.bf16.msra.mxu1 %v615_v17  ;;  %v1771_v17 = vcombine.high %v822_v12, %v822_v12 }
 0x181   : > { %v653_v19 = vpop.permute.xlu0 %652  ;;  %v631_v20 = vpop.permute.xlu1 %630 }
 0x182   : > { %v637_v21 = vsel %vm636_vm6, %v629_v11, %v631_v20  ;;  %v638_v22 = vsel %vm636_vm6, %v631_v20, %v633_v15  ;;  %v1961_v20 = vld [vmem:[%s2375_s7 + $0xc0] sm:$0xff]  }
 0x183   : > { %901 = vmatprep.subr.bf16.mxu0 %v638_v22 }
 0x184   : > { %902 = vmatpush1.bf16.msra.mxu0 %v637_v21 }
 0x185   : > { %v657_v23 = vpop.permute.xlu0 %656  ;;  %v635_v24 = vpop.permute.xlu1 %634 }
 0x186   : > { %v639_v25 = vsel %vm636_vm6, %v633_v15, %v635_v24  ;;  %v646_v26 = vsel %vm636_vm6, %v635_v24, %v629_v11  ;;  %v1963_v24 = vld [vmem:[%s2375_s7 + $0x80] sm:$0xff]  }
 0x187   : > { %952 = vmatprep.subr.bf16.mxu1 %v646_v26  ;;  %v1965_v26 = vld [vmem:[%s2375_s7 + $0xc8] sm:$0xff]  }
 0x188   : > { %953 = vmatpush1.bf16.msra.mxu1 %v639_v25  ;;  %v1962_v25 = vld [vmem:[%s2375_s7 + $0x8] sm:$0xff]  }
 0x189   : > { %v677_v27 = vpop.permute.xlu0 %676  ;;  %v655_v28 = vpop.permute.xlu1 %654 }
 0x18a   : > { %v661_v29 = vsel %vm660_vm7, %v653_v19, %v655_v28  ;;  %v662_v30 = vsel %vm660_vm7, %v655_v28, %v657_v23  ;;  %v1770_v28 = vcombine.low %v822_v12, %v822_v12 }
 0x18b   : > { %903 = vmatprep.subr.bf16.mxu0 %v662_v30  ;;  %v1966_v30 = vld [vmem:[%s2375_s7 + $0x10] sm:$0xff]  }
 0x18c   : > { %904 = vmatpush1.bf16.msra.mxu0 %v661_v29  ;;  %v1967_v29 = vld [vmem:[%s2375_s7 + $0x88] sm:$0xff]  }
 0x18d   : > { %v681_v31 = vpop.permute.xlu0 %680  ;;  %v659_v32 = vpop.permute.xlu1 %658 }
 0x18e   : > { %v663_v33 = vsel %vm660_vm7, %v657_v23, %v659_v32  ;;  %v670_v34 = vsel %vm660_vm7, %v659_v32, %v653_v19  ;;  %v1959_v19 = vld [vmem:[%s2375_s7] sm:$0xff]   ;;  %v1960_v23 = vld [vmem:[%s2375_s7 + $0x48] sm:$0xff]   ;;  %v1968_v32 = vld [vmem:[%s2375_s7 + $0x58] sm:$0xff]  }
 0x18f   : > { %954 = vmatprep.subr.bf16.mxu1 %v670_v34  ;;  %v1970_v34 = vld [vmem:[%s2375_s7 + $0x18] sm:$0xff]  }
 0x190   : > { %955 = vmatpush1.bf16.msra.mxu1 %v663_v33  ;;  %v1971_v33 = vld [vmem:[%s2375_s7 + $0x90] sm:$0xff]  }
 0x191   : > { %v701_v35 = vpop.permute.xlu0 %700  ;;  %v679_v36 = vpop.permute.xlu1 %678 }
 0x192   : > { %v685_v37 = vsel %vm684_vm8, %v677_v27, %v679_v36  ;;  %v686_v38 = vsel %vm684_vm8, %v679_v36, %v681_v31  ;;  %v1973_v36 = vld [vmem:[%s2375_s7 + $0x60] sm:$0xff]  }
 0x193   : > { %905 = vmatprep.subr.bf16.mxu0 %v686_v38  ;;  %v1974_v38 = vld [vmem:[%s2375_s7 + $0x20] sm:$0xff]  }
 0x194   : > { %906 = vmatpush1.bf16.msra.mxu0 %v685_v37  ;;  %v1975_v37 = vld [vmem:[%s2375_s7 + $0x98] sm:$0xff]  }
 0x195   : > { %v705_v39 = vpop.permute.xlu0 %704  ;;  %v683_v40 = vpop.permute.xlu1 %682 }
 0x196   : > { %v687_v41 = vsel %vm684_vm8, %v681_v31, %v683_v40  ;;  %v694_v42 = vsel %vm684_vm8, %v683_v40, %v677_v27  ;;  %v1964_v27 = vld [vmem:[%s2375_s7 + $0x50] sm:$0xff]   ;;  %v1977_v40 = vld [vmem:[%s2375_s7 + $0x68] sm:$0xff]  }
 0x197   : > { %956 = vmatprep.subr.bf16.mxu1 %v694_v42  ;;  %v1969_v31 = vld [vmem:[%s2375_s7 + $0xd0] sm:$0xff]   ;;  %v1979_v42 = vld [vmem:[%s2375_s7 + $0xa0] sm:$0xff]  }
 0x198   : > { %957 = vmatpush1.bf16.msra.mxu1 %v687_v41  ;;  %v1978_v41 = vld [vmem:[%s2375_s7 + $0x28] sm:$0xff]  }
 0x199   : > { %v725_v43 = vpop.permute.xlu0 %724  ;;  %v703_v44 = vpop.permute.xlu1 %702 }
 0x19a   : > { %v709_v45 = vsel %vm708_vm9, %v701_v35, %v703_v44  ;;  %v710_v46 = vsel %vm708_vm9, %v703_v44, %v705_v39  ;;  %v1981_v44 = vld [vmem:[%s2375_s7 + $0x70] sm:$0xff]  }
 0x19b   : > { %907 = vmatprep.subr.bf16.mxu0 %v710_v46  ;;  %v1983_v46 = vld [vmem:[%s2375_s7 + $0xa8] sm:$0xff]  }
 0x19c   : > { %908 = vmatpush1.bf16.msra.mxu0 %v709_v45  ;;  %v1982_v45 = vld [vmem:[%s2375_s7 + $0x30] sm:$0xff]  }
 0x19d   : > { %v729_v47 = vpop.permute.xlu0 %728  ;;  %v707_v48 = vpop.permute.xlu1 %706 }
 0x19e   : > { %v711_v49 = vsel %vm708_vm9, %v705_v39, %v707_v48  ;;  %v718_v50 = vsel %vm708_vm9, %v707_v48, %v701_v35  ;;  %v1972_v35 = vld [vmem:[%s2375_s7 + $0xd8] sm:$0xff]   ;;  %v1976_v39 = vld [vmem:[%s2375_s7 + $0xe0] sm:$0xff]   ;;  %v1985_v48 = vld [vmem:[%s2375_s7 + $0xf0] sm:$0xff]  }
 0x19f   : > { %958 = vmatprep.subr.bf16.mxu1 %v718_v50  ;;  %v1987_v50 = vld [vmem:[%s2375_s7 + $0xb0] sm:$0xff]  }
 0x1a0   : > { %959 = vmatpush1.bf16.msra.mxu1 %v711_v49  ;;  %v1986_v49 = vld [vmem:[%s2375_s7 + $0x38] sm:$0xff]  }
 0x1a1   : > { %v749_v51 = vpop.permute.xlu0 %748  ;;  %v727_v52 = vpop.permute.xlu1 %726 }
 0x1a2   : > { %v733_v53 = vsel %vm732_vm10, %v725_v43, %v727_v52  ;;  %v734_v54 = vsel %vm732_vm10, %v727_v52, %v729_v47  ;;  %v1989_v52 = vld [vmem:[%s2375_s7 + $0xb8] sm:$0xff]  }
 0x1a3   : > { %909 = vmatprep.subr.bf16.mxu0 %v734_v54 }
 0x1a4   : > { %910 = vmatpush1.bf16.msra.mxu0 %v733_v53 }
 0x1a5   : > { %v753_v55 = vpop.permute.xlu0 %752  ;;  %v731_v56 = vpop.permute.xlu1 %730 }
 0x1a6   : > { %v735_v57 = vsel %vm732_vm10, %v729_v47, %v731_v56  ;;  %v742_v58 = vsel %vm732_vm10, %v731_v56, %v725_v43  ;;  %v1980_v43 = vld [vmem:[%s2375_s7 + $0xe8] sm:$0xff]   ;;  %v1984_v47 = vld [vmem:[%s2375_s7 + $0x78] sm:$0xff]  }
 0x1a7   : > { %960 = vmatprep.subr.bf16.mxu1 %v742_v58 }
 0x1a8   : > { %961 = vmatpush1.bf16.msra.mxu1 %v735_v57 }
 0x1a9   : > { %v773_v59 = vpop.permute.xlu0 %772  ;;  %v751_v60 = vpop.permute.xlu1 %750 }
 0x1aa   : > { %v757_v61 = vsel %vm756_vm11, %v749_v51, %v751_v60  ;;  %v758_v62 = vsel %vm756_vm11, %v751_v60, %v753_v55 }
 0x1ab   : > { %911 = vmatprep.subr.bf16.mxu0 %v758_v62 }
 0x1ac   : > { %912 = vmatpush1.bf16.msra.mxu0 %v757_v61 }
 0x1ad   : > { %v777_v63 = vpop.permute.xlu0 %776  ;;  %v755_v0 = vpop.permute.xlu1 %754 }
 0x1ae   : > { %v759_v1 = vsel %vm756_vm11, %v753_v55, %v755_v0  ;;  %v766_v2 = vsel %vm756_vm11, %v755_v0, %v749_v51  ;;  %v1988_v51 = vld [vmem:[%s2375_s7 + $0xf8] sm:$0xff]  }
 0x1af   : > { %962 = vmatprep.subr.bf16.mxu1 %v766_v2 }
 0x1b0   : > { %963 = vmatpush1.bf16.msra.mxu1 %v759_v1 }
 0x1b1   : > { %v775_v3 = vpop.permute.xlu1 %774  ;;  %v797_v6 = vpop.permute.xlu0 %796 }
 0x1b2   : > { %v781_v4 = vsel %vm780_vm12, %v773_v59, %v775_v3  ;;  %v782_v5 = vsel %vm780_vm12, %v775_v3, %v777_v63 }
 0x1b3   : > { %913 = vmatprep.subr.bf16.mxu0 %v782_v5 }
 0x1b4   : > { %914 = vmatpush1.bf16.msra.mxu0 %v781_v4 }
 0x1b5   : > { %v779_v7 = vpop.permute.xlu1 %778  ;;  %v801_v10 = vpop.permute.xlu0 %800 }
 0x1b6   : > { %v783_v8 = vsel %vm780_vm12, %v777_v63, %v779_v7  ;;  %v790_v9 = vsel %vm780_vm12, %v779_v7, %v773_v59 }
 0x1b7   : > { %964 = vmatprep.subr.bf16.mxu1 %v790_v9 }
 0x1b8   : > { %965 = vmatpush1.bf16.msra.mxu1 %v783_v8 }
 0x1b9   : > { %v799_v11 = vpop.permute.xlu1 %798 }
 0x1ba   : > { %v805_v14 = vsel %vm804_vm13, %v797_v6, %v799_v11  ;;  %v806_v15 = vsel %vm804_vm13, %v799_v11, %v801_v10 }
 0x1bb   : > { %915 = vmatprep.subr.bf16.mxu0 %v806_v15 }
 0x1bc   : > { %916 = vmatpush1.bf16.msra.mxu0 %v805_v14 }
 0x1bd   : > { %v803_v18 = vpop.permute.xlu1 %802  ;;  %1821 = vmatprep.subr.bf16.mxu0 %v1958_v13 }
 0x1be   : > { %v807_v21 = vsel %vm804_vm13, %v801_v10, %v803_v18  ;;  %v814_v22 = vsel %vm804_vm13, %v803_v18, %v797_v6 }
 0x1bf   : > { %926 = vmatmul.mubr.bf16.vlgmr.msra.gmra.mrb[4].mxu0 %v1955_v16  ;;  %966 = vmatprep.subr.bf16.mxu1 %v814_v22 }
 0x1c0   : > { %967 = vmatpush1.bf16.msra.mxu1 %v807_v21  ;;  %1773 = vmatprep.mubr.msk.bf16.mxu0 %vm886_vm2, %v1771_v17 }
 0x1c1   : > { %1822 = vmatpush3.bf16.msra.mxu0 %v1959_v19  ;;  %1849 = vmatprep.subr.bf16.mxu1 %v1961_v20 }
 0x1c2   : > { %1823 = vmatprep.subr.bf16.mxu0 %v1960_v23 }
 0x1c3   : > { %977 = vmatmul.mubr.bf16.vlgmr.msra.gmra.mrb[4].mxu1 %v1955_v16 }
 0x1c4   : > { %1775 = vmatprep.mubr.msk.bf16.mxu1 %vm886_vm2, %v1771_v17  ;;  %1850 = vmatpush3.bf16.msra.mxu1 %v1963_v24  ;;  %vm1691_vm2 = vcmask 1041408  }
 0x1c5   : > { %1824 = vmatpush3.bf16.msra.mxu0 %v1962_v25  ;;  %1851 = vmatprep.subr.bf16.mxu1 %v1965_v26 }
 0x1c6   : > { %1825 = vmatprep.subr.bf16.mxu0 %v1964_v27  ;;  %v1001_v53 = vpop.permute.xlu0 %1000 }
 0x1c7   : > { %936 = vmatmul.mubr.bf16.gmra.mrb[8].mxu0 %v1770_v28 }
 0x1c8   : > { %1852 = vmatpush3.bf16.msra.mxu1 %v1967_v29 }
 0x1c9   : > { %1826 = vmatpush3.bf16.msra.mxu0 %v1966_v30  ;;  %1853 = vmatprep.subr.bf16.mxu1 %v1969_v31 }
 0x1ca   : > { %1827 = vmatprep.subr.bf16.mxu0 %v1968_v32  ;;  %v1031_v58 = vpop.permute.xlu0 %1030 }
 0x1cb   : > { %987 = vmatmul.mubr.bf16.gmra.mrb[8].mxu1 %v1770_v28 }
 0x1cc   : > { %1854 = vmatpush3.bf16.msra.mxu1 %v1971_v33 }
 0x1cd   : > { %1828 = vmatpush3.bf16.msra.mxu0 %v1970_v34  ;;  %1855 = vmatprep.subr.bf16.mxu1 %v1972_v35 }
 0x1ce   : > { %1829 = vmatprep.subr.bf16.mxu0 %v1973_v36  ;;  %v1006_v54 = vpop.permute.xlu1 %1005  ;;  %v1011_v15 = vpop.permute.xlu0 %1010 }
 0x1d0   : > { %1856 = vmatpush3.bf16.msra.mxu1 %v1975_v37 }
 0x1d1   : > { %1830 = vmatpush3.bf16.msra.mxu0 %v1974_v38  ;;  %1857 = vmatprep.subr.bf16.mxu1 %v1976_v39 }
 0x1d2   : > { %1831 = vmatprep.subr.bf16.mxu0 %v1977_v40  ;;  %v1036_v0 = vpop.permute.xlu1 %1035 }
 0x1d4   : > { %1858 = vmatpush3.bf16.msra.mxu1 %v1979_v42 }
 0x1d5   : > { %1832 = vmatpush3.bf16.msra.mxu0 %v1978_v41  ;;  %1859 = vmatprep.subr.bf16.mxu1 %v1980_v43 }
 0x1d6   : > { %1833 = vmatprep.subr.bf16.mxu0 %v1981_v44  ;;  %v1041_v25 = vpop.permute.xlu1 %1040 }
 0x1d8   : > { %1860 = vmatpush3.bf16.msra.mxu1 %v1983_v46 }
 0x1d9   : > { %1834 = vmatpush3.bf16.msra.mxu0 %v1982_v45  ;;  %1861 = vmatprep.subr.bf16.mxu1 %v1985_v48 }
 0x1da   : > { %1835 = vmatprep.subr.bf16.mxu0 %v1984_v47 }
 0x1dc   : > { %1862 = vmatpush3.bf16.msra.mxu1 %v1987_v50 }
 0x1dd   : > { %1836 = vmatpush3.bf16.msra.mxu0 %v1986_v49  ;;  %1863 = vmatprep.subr.bf16.mxu1 %v1988_v51 }
 0x1e0   : > { %1864 = vmatpush3.bf16.msra.mxu1 %v1989_v52 }
 0x292   : > { %v927_v55 = vpop.f32.mrb[4].mxu0 }
 0x293   : > { %v1013_v56 = vmul.f32 %v1001_v53, %v927_v55  ;;  %v929_v57 = vpop.f32.mrb[5].mxu0  ;;  %v1471_v55 = vld [vmem:[%s2377_s9] sm:$0xff] }
 0x294   : > { %v1014_v59 = vmul.f32 %v1001_v53, %v929_v57  ;;  %v931_v60 = vpop.f32.mrb[6].mxu0 }
 0x295   : > { %v1043_v61 = vadd.f32 %v1031_v58, %v1013_v56  ;;  %v1017_v62 = vmul.f32 %v1006_v54, %v931_v60  ;;  %v933_v63 = vpop.f32.mrb[7].mxu0  ;;  %v1472_v56 = vld [vmem:[%s2377_s9 + $0x8] sm:$0xff] }
 0x296   : > { %v1044_v1 = vadd.f32 %v1031_v58, %v1014_v59  ;;  %v1018_v2 = vmul.f32 %v1006_v54, %v933_v63  ;;  %v978_v3 = vpop.f32.mrb[4].mxu1  ;;  %v1914_v57 = vpack.c.bf16 %v1472_v56, %v1471_v55  ;;  %v1474_v59 = vld [vmem:[%s2377_s9 + $0x18] sm:$0xff]  ;;  %v1460_v55 = vld [vmem:[%s2376_s8 + $0x48] sm:$0xff] }
 0x297   : > { %v1047_v4 = vadd.f32 %v1036_v0, %v1017_v62  ;;  %v1015_v5 = vmul.f32 %v1001_v53, %v978_v3  ;;  %v980_v6 = vpop.f32.mrb[5].mxu1  ;;  %v1055_v10 = vmul.f32 %v1043_v61, %v1043_v61 }
 0x298   : > { %v1048_v7 = vadd.f32 %v1036_v0, %v1018_v2  ;;  %v1016_v8 = vmul.f32 %v1001_v53, %v980_v6  ;;  %v982_v9 = vpop.f32.mrb[6].mxu1  ;;  %v1056_v16 = vmul.f32 %v1044_v1, %v1044_v1  ;;  %1915 = vmatprep.subr.bf16.mxu0 %v1914_v57  ;;  %1922 = vmatprep.subr.bf16.mxu1 %v1914_v57 }
 0x299   : > { %v1059_v11 = vmul.f32 %v1047_v4, %v1047_v4  ;;  %v1045_v12 = vadd.f32 %v1031_v58, %v1015_v5  ;;  %v1019_v13 = vmul.f32 %v1006_v54, %v982_v9  ;;  %v984_v14 = vpop.f32.mrb[7].mxu1 }
 0x29a   : > { %v1060_v17 = vmul.f32 %v1048_v7, %v1048_v7  ;;  %v1046_v18 = vadd.f32 %v1031_v58, %v1016_v8  ;;  %v1020_v19 = vmul.f32 %v1006_v54, %v984_v14  ;;  %v937_v20 = vpop.f32.mrb[8].mxu0  ;;  %v1473_v58 = vld [vmem:[%s2377_s9 + $0x10] sm:$0xff] }
 0x29b   : > { %v1067_v21 = vpack.c.bf16 %v1059_v11, %v1055_v10  ;;  %v1049_v22 = vadd.f32 %v1036_v0, %v1019_v13  ;;  %v1021_v23 = vmul.f32 %v1011_v15, %v937_v20  ;;  %v939_v24 = vpop.f32.mrb[9].mxu0  ;;  %v1057_v30 = vmul.f32 %v1045_v12, %v1045_v12 }
 0x29c   : > { %v1050_v26 = vadd.f32 %v1036_v0, %v1020_v19  ;;  %v1022_v27 = vmul.f32 %v1011_v15, %v939_v24  ;;  %v1068_v28 = vpack.c.bf16 %v1060_v17, %v1056_v16  ;;  %v941_v29 = vpop.f32.mrb[10].mxu0  ;;  %v1058_v34 = vmul.f32 %v1046_v18, %v1046_v18 }
 0x29d   : > { %v1061_v31 = vmul.f32 %v1049_v22, %v1049_v22  ;;  %v1051_v32 = vadd.f32 %v1041_v25, %v1021_v23  ;;  %v942_v33 = vpop.f32.mrb[11].mxu0  ;;  %v1918_v60 = vpack.c.bf16 %v1474_v59, %v1473_v58  ;;  %v1451_v29 = vld [vmem:[%s2376_s8] sm:$0xff] }
 0x29e   : > { %v1062_v35 = vmul.f32 %v1050_v26, %v1050_v26  ;;  %v1052_v36 = vadd.f32 %v1041_v25, %v1022_v27  ;;  %v988_v37 = vpop.f32.mrb[8].mxu1  ;;  %1363 = vmatprep.mubr.bf16.mxu0 %v1068_v28  ;;  %v1457_v33 = vld [vmem:[%s2376_s8 + $0x30] sm:$0xff] }
 0x29f   : > { %v1069_v38 = vpack.c.bf16 %v1061_v31, %v1057_v30  ;;  %v1023_v39 = vmul.f32 %v1011_v15, %v988_v37  ;;  %v990_v40 = vpop.f32.mrb[9].mxu1  ;;  %1364 = vmatmul.mubr.bf16.vlgmr.msra.gmra.mrb[12].mxu0 %v1067_v21  ;;  %v1063_v45 = vmul.f32 %v1051_v32, %v1051_v32  ;;  %v1452_v32 = vld [vmem:[%s2376_s8 + $0x8] sm:$0xff] }
 0x2a0   : > { %v1064_v41 = vmul.f32 %v1052_v36, %v1052_v36  ;;  %v1024_v42 = vmul.f32 %v1011_v15, %v990_v40  ;;  %v992_v43 = vpop.f32.mrb[10].mxu1  ;;  %v1070_v44 = vpack.c.bf16 %v1062_v35, %v1058_v34  ;;  %1917 = vmatpush3.bf16.msra.mxu0 %v1914_v57 }
 0x2a1   : > { %v1053_v46 = vadd.f32 %v1041_v25, %v1023_v39  ;;  %v993_v47 = vpop.f32.mrb[11].mxu1  ;;  %v1071_v51 = vpack.c.bf16 %v1063_v45, %v1063_v45  ;;  %1919 = vmatprep.subr.bf16.mxu0 %v1918_v60  ;;  %v1453_v43 = vld [vmem:[%s2376_s8 + $0x10] sm:$0xff]  ;;  %v1454_v45 = vld [vmem:[%s2376_s8 + $0x18] sm:$0xff] }
 0x2a2   : > { %v1072_v48 = vpack.c.bf16 %v1064_v41, %v1064_v41  ;;  %v1054_v49 = vadd.f32 %v1041_v25, %v1024_v42  ;;  %1411 = vmatprep.mubr.bf16.mxu1 %v1070_v44  ;;  %v1458_v44 = vld [vmem:[%s2376_s8 + $0x38] sm:$0xff] }
 0x2a3   : > { %1412 = vmatmul.mubr.bf16.vlgmr.msra.gmra.mrb[12].mxu1 %v1069_v38  ;;  %v1065_v52 = vmul.f32 %v1053_v46, %v1053_v46  ;;  %v1459_v46 = vld [vmem:[%s2376_s8 + $0x40] sm:$0xff] }
 0x2a4   : > { %v1066_v50 = vmul.f32 %v1054_v49, %v1054_v49  ;;  %1371 = vmatprep.mubr.bf16.mxu0 %v1072_v48  ;;  %1924 = vmatpush3.bf16.msra.mxu1 %v1914_v57  ;;  %v1455_v49 = vld [vmem:[%s2376_s8 + $0x20] sm:$0xff]  ;;  %v1456_v57 = vld [vmem:[%s2376_s8 + $0x28] sm:$0xff] }
 0x2a5   : > { %v1073_v54 = vpack.c.bf16 %v1065_v52, %v1065_v52  ;;  %1923 = vmatprep.subr.bf16.mxu1 %v1918_v60  ;;  %1921 = vmatpush3.bf16.msra.mxu0 %v1918_v60 }
 0x2a6   : > { %v1074_v53 = vpack.c.bf16 %v1066_v50, %v1066_v50 }
 0x2a7   : > { %1372 = vmatmul.mubr.bf16.gmra.mrb[16].mxu0 %v1071_v51 }
 0x2a8   : > { %1419 = vmatprep.mubr.bf16.mxu1 %v1074_v53  ;;  %1925 = vmatpush3.bf16.msra.mxu1 %v1918_v60 }
 0x2ab   : > { %1420 = vmatmul.mubr.bf16.gmra.mrb[16].mxu1 %v1073_v54 }
 0x372   : > { %v1837_v61 = vpop.f32.mrb[12].mxu0 }
 0x373   : > { %v1838_v62 = vpop.f32.mrb[13].mxu0 }
 0x374   : > { %v1839_v63 = vadd.f32 %v1838_v62, %v1837_v61  ;;  %v1840_v0 = vpop.f32.mrb[14].mxu0 }
 0x375   : > { %v1841_v1 = vpop.f32.mrb[15].mxu0 }
 0x376   : > { %v1842_v2 = vadd.f32 %v1841_v1, %v1840_v0  ;;  %v1865_v3 = vpop.f32.mrb[12].mxu1 }
 0x377   : > { %v1866_v4 = vpop.f32.mrb[13].mxu1 }
 0x378   : > { %v1867_v5 = vadd.f32 %v1866_v4, %v1865_v3  ;;  %v1868_v6 = vpop.f32.mrb[14].mxu1 }
 0x379   : > { %v1869_v7 = vpop.f32.mrb[15].mxu1 }
 0x37a   : > { %v1414_v8 = vadd.f32 %v1867_v5, %v1839_v63  ;;  %v1870_v9 = vadd.f32 %v1869_v7, %v1868_v6  ;;  %v1843_v10 = vpop.f32.mrb[16].mxu0 }
 0x37b   : > { %v1844_v11 = vpop.f32.mrb[17].mxu0 }
 0x37c   : > { %v1427_v12 = vmul.f32 0.016129032, %v1414_v8  ;;  %v1417_v13 = vadd.f32 %v1870_v9, %v1842_v2  ;;  %v1845_v14 = vadd.f32 %v1844_v11, %v1843_v10  ;;  %v1846_v15 = vpop.f32.mrb[18].mxu0 }
 0x37d   : > { %v1847_v16 = vpop.f32.mrb[19].mxu0 }
 0x37e   : > { %v1430_v17 = vmax.f32 %v1427_v12, 1e-37  ;;  %v1428_v18 = vmul.f32 0.016129032, %v1417_v13  ;;  %v1871_v19 = vpop.f32.mrb[16].mxu1 }
 0x37f   : > { %v1872_v20 = vpop.f32.mrb[17].mxu1 }
 0x380   : > { %1990 = vlog2.f32 %v1430_v17  ;;  %v1431_v21 = vmax.f32 %v1428_v18, 1e-37  ;;  %v1873_v22 = vadd.f32 %v1872_v20, %v1871_v19  ;;  %v1874_v23 = vpop.f32.mrb[18].mxu1 }
 0x381   : > { %v1875_v24 = vpop.f32.mrb[19].mxu1 }
 0x382   : > { %1992 = vlog2.f32 %v1431_v21  ;;  %v1422_v25 = vadd.f32 %v1873_v22, %v1845_v14 }
 0x384   : > { %v1429_v26 = vmul.f32 0.016129032, %v1422_v25 }
 0x386   : > { %v1432_v27 = vmax.f32 %v1429_v26, 1e-37 }
 0x388   : > { %1994 = vlog2.f32 %v1432_v27 }
 0x38a   : > { %v1991_v28 = vpop.eup %1990 }
 0x38b   : > { %v1434_v30 = vmul.f32 0.6931472, %v1991_v28 }
 0x38c   : > { %v1993_v31 = vpop.eup %1992 }
 0x38d   : > { %v1436_v34 = vmul.f32 0.6931472, %v1993_v31  ;;  %v1461_v35 = vmul.f32 %v1451_v29, %v1434_v30  ;;  %v1442_v36 = vrot.slane %v1434_v30, 4  ;;  %v1466_v59 = vmul.f32 %v1456_v57, %v1434_v30 }
 0x38f   : > { %v1443_v37 = vrot.slane %v1436_v34, 4  ;;  %v1462_v38 = vmul.f32 %v1452_v32, %v1436_v34  ;;  %1899 = vmatprep.mubr.msk.f32.mxu0 %vm1475_vm14, %v1461_v35  ;;  %v1467_v39 = vmul.f32 %v1457_v33, %v1436_v34 }
 0x391   : > { %1900 = vmatmul.mubr.msk.f32.vlgmr.msra.gmra.mrb[20].mxu0 %vm1475_vm14, %v1462_v38  ;;  %1908 = vmatprep.mubr.msk.f32.mxu1 %vm1475_vm14, %v1467_v39  ;;  %v1444_v40 = vsel %vm409_vm0, %v1442_v36, %v1443_v37 }
 0x392   : > { %v1995_v41 = vpop.eup %1994  ;;  %v1464_v52 = vmul.f32 %v1454_v45, %v1444_v40  ;;  %v1469_v53 = vmul.f32 %v1459_v46, %v1444_v40 }
 0x393   : > { %v1438_v42 = vmul.f32 0.6931472, %v1995_v41 }
 0x395   : > { %v1445_v47 = vrot.slane %v1438_v42, 4  ;;  %v1450_v48 = vsel %vm409_vm0, %v1438_v42, %v1442_v36 }
 0x396   : > { %v1463_v50 = vmul.f32 %v1453_v43, %v1450_v48  ;;  %v1468_v51 = vmul.f32 %v1458_v44, %v1450_v48 }
 0x397   : > { %v1446_v54 = vsel %vm409_vm0, %v1443_v37, %v1445_v47 }
 0x398   : > { %1902 = vmatprep.mubr.msk.f32.mxu0 %vm1475_vm14, %v1463_v50  ;;  %1909 = vmatmul.mubr.msk.f32.vlgmr.msra.gmra.mrb[20].mxu1 %vm1475_vm14, %v1468_v51  ;;  %v1465_v56 = vmul.f32 %v1455_v49, %v1446_v54  ;;  %v1470_v58 = vmul.f32 %v1460_v55, %v1446_v54 }
 0x399   : > { %1903 = vmatmul.mubr.msk.f32.gmra.mrb[22].mxu0 %vm1475_vm14, %v1464_v52  ;;  %1911 = vmatprep.mubr.msk.f32.mxu1 %vm1475_vm14, %v1469_v53 }
 0x39a   : > { %1905 = vmatprep.mubr.msk.f32.mxu0 %vm1475_vm14, %v1465_v56 }
 0x39c   : > { %1912 = vmatmul.mubr.msk.f32.gmra.mrb[22].mxu1 %vm1475_vm14, %v1470_v58 }
 0x39d   : > { %1906 = vmatmul.mubr.msk.f32.gmra.mrb[24].mxu0 %vm1475_vm14, %v1466_v59 }
 0x464   : > { %v1901_v60 = vpop.f32.mrb[20].mxu0 }
 0x465   : > { %v1623_v61 = vsel %vm1621_vm15, %v1901_v60, 0.0  ;;  %v1572_v62 = vpop.f32.mrb[21].mxu0 }
 0x466   : > { %v1622_v63 = vsel %vm1621_vm15, %v1572_v62, 0.0 }
 0x467   : > { %v1624_v0 = vadd.f32 %v1623_v61, %v1622_v63  ;;  %v1695_v61 = vld [vmem:[%s2378_s10] sm:$0xf] }
 0x46b   : > { %v1910_v1 = vpop.f32.mrb[20].mxu1 }
 0x46c   : > { %v1904_v2 = vpop.f32.mrb[22].mxu0  ;;  %v1602_v3 = vpop.f32.mrb[21].mxu1  ;;  %v1670_v10 = vrot.slane %v1910_v1, 4  ;;  %v1659_v22 = vsel %vm1625_vm1, %v1910_v1, 0.0 }
 0x46d   : > { %v1638_v4 = vrot.slane %v1904_v2, 4  ;;  %v1582_v5 = vpop.f32.mrb[23].mxu0  ;;  %v1657_v15 = vsel %vm1621_vm15, %v1602_v3, 0.0 }
 0x46e   : > { %v1626_v6 = vsel %vm1625_vm1, %v1582_v5, 0.0  ;;  %v1637_v7 = vrot.slane %v1582_v5, 4 }
 0x46f   : > { %v1627_v8 = vadd.f32 %v1626_v6, %v1624_v0  ;;  %v1913_v9 = vpop.f32.mrb[22].mxu1 }
 0x470   : > { %v1639_v11 = vsel %vm409_vm0, %v1637_v7, %v1638_v4  ;;  %v1673_v12 = vrot.slane %v1913_v9, 4  ;;  %v1907_v13 = vpop.f32.mrb[24].mxu0  ;;  %v1612_v14 = vpop.f32.mrb[23].mxu1 }
 0x471   : > { %v1628_v16 = vrot.slane %v1627_v8, 4  ;;  %v1656_v17 = vsel %vm1621_vm15, %v1907_v13, 0.0  ;;  %v1671_v18 = vrot.slane %v1612_v14, 4  ;;  %v1592_v19 = vpop.f32.mrb[25].mxu0  ;;  %v1645_v31 = vsel %vm1621_vm15, %v1639_v11, 0.0 }
 0x472   : > { %v1658_v20 = vadd.f32 %v1657_v15, %v1656_v17  ;;  %v1640_v21 = vrot.slane %v1592_v19, 4  ;;  %v1681_v33 = vsel %vm1625_vm1, %v1673_v12, 0.0 }
 0x473   : > { %v1629_v23 = vadd.f32 %v1628_v16, %v1627_v8  ;;  %v1672_v24 = vsel %vm409_vm0, %v1670_v10, %v1671_v18  ;;  %v1674_v25 = vsel %vm409_vm0, %v1671_v18, %v1673_v12 }
 0x474   : > { %v1660_v26 = vadd.f32 %v1659_v22, %v1658_v20  ;;  %v1678_v27 = vsel %vm1621_vm15, %v1672_v24, 0.0  ;;  %v1679_v28 = vsel %vm1621_vm15, %v1674_v25, 0.0  ;;  %v1641_v29 = vsel %vm409_vm0, %v1638_v4, %v1640_v21 }
 0x475   : > { %v1680_v30 = vadd.f32 %v1679_v28, %v1678_v27  ;;  %v1646_v32 = vsel %vm1621_vm15, %v1641_v29, 0.0  ;;  %v1648_v37 = vsel %vm1625_vm1, %v1640_v21, 0.0  ;;  %v1630_v38 = vrot.slane %v1629_v23, 2 }
 0x476   : > { %v1661_v34 = vrot.slane %v1660_v26, 4  ;;  %v1647_v35 = vadd.f32 %v1646_v32, %v1645_v31  ;;  %vm1689_vm0 = vcmask 1040384  }
 0x477   : > { %v1682_v36 = vadd.f32 %v1681_v33, %v1680_v30  ;;  %v1631_v45 = vadd.f32 %v1630_v38, %v1629_v23 }
 0x478   : > { %v1662_v39 = vadd.f32 %v1661_v34, %v1660_v26  ;;  %v1649_v40 = vadd.f32 %v1648_v37, %v1647_v35 }
 0x479   : > { %v1683_v41 = vrot.slane %v1682_v36, 4  ;;  %v1632_v51 = vrot.slane %v1631_v45, 1 }
 0x47a   : > { %v1663_v42 = vrot.slane %v1662_v39, 2  ;;  %v1650_v43 = vrot.slane %v1649_v40, 4 }
 0x47b   : > { %v1684_v44 = vadd.f32 %v1683_v41, %v1682_v36  ;;  %v1633_v56 = vadd.f32 %v1632_v51, %v1631_v45 }
 0x47c   : > { %v1651_v46 = vadd.f32 %v1650_v43, %v1649_v40  ;;  %v1664_v47 = vadd.f32 %v1663_v42, %v1662_v39 }
 0x47d   : > { %v1685_v48 = vrot.slane %v1684_v44, 2 }
 0x47e   : > { %v1652_v49 = vrot.slane %v1651_v46, 2  ;;  %v1665_v53 = vrot.slane %v1664_v47, 1 }
 0x47f   : > { %v1686_v50 = vadd.f32 %v1685_v48, %v1684_v44 }
 0x480   : > { %v1653_v52 = vadd.f32 %v1652_v49, %v1651_v46  ;;  %v1666_v58 = vadd.f32 %v1665_v53, %v1664_v47 }
 0x481   : > { %v1687_v54 = vrot.slane %v1686_v50, 1 }
 0x482   : > { %v1654_v55 = vrot.slane %v1653_v52, 1 }
 0x483   : > { %v1688_v59 = vadd.f32 %v1687_v54, %v1686_v50 }
 0x484   : > { %v1655_v57 = vadd.f32 %v1654_v55, %v1653_v52 }
 0x486   : > { %v1690_v60 = vsel %vm1689_vm0, %v1633_v56, %v1655_v57 }
 0x487   : > { %v1692_v62 = vsel %vm1691_vm2, %v1690_v60, %v1666_v58 }
 0x488   : > { %v1694_v63 = vsel %vm1693_vm3, %v1692_v62, %v1688_v59 }
 0x489   : > { %v1696_v0 = vadd.f32 %v1695_v61, %v1694_v63 }
 0x48b   : > { %1697 = vst.msk [vmem:[%s384_s16] sm:$0xf] %vm1625_vm1, %v1696_v0 }
 0x48c PF: > { %s21_s17 = sadd.s32 1, %s2002_s17  }
 0x48d   : > { %p18_p4 = scmp.ge.s32.totalorder %s21_s17, 4  }
 0x48f   :  { %20 = sbr.rel (!%p18_p4) target bundleno = 1 (0x1), region = 94 }

</bundles_post_ra>
